<compile_context>
chip_gen: v7x
topology: tpu7x:2x2x1
jax: 0.10.0
libtpu: 0.0.40
codegen_flags: <defaults>
</compile_context>

<pallas_src>
import jax
import jax.numpy as jnp
import numpy as np
from jax.experimental import pallas as pl
from jax.experimental.pallas import tpu as pltpu

# -----------------------------------------------------------------------------
# Synthetic supernet configuration (deterministic, built in-script)
# -----------------------------------------------------------------------------
PRIMITIVES = ["gcn", "sage", "one-hot", "gin", "linear"]
ONE_HOT_IDX = PRIMITIVES.index("one-hot")
NUM_OPS = len(PRIMITIVES)

_HP = jax.lax.Precision.HIGHEST


def _round_up(x, m):
    return ((x + m - 1) // m) * m


def _pick_tile(n, cap):
    """Largest multiple of 128 that divides n (n is a multiple of 128), <= cap."""
    t = max(128, min(cap, n))
    t -= t % 128
    while t > 128 and n % t:
        t -= 128
    return t


# -----------------------------------------------------------------------------
# Pass 1: fused candidate projection  H = x @ W_eff + beta * one_hot_h
# -----------------------------------------------------------------------------
def _project_kernel(x_ref, w_ref, oh_ref, sc_ref, h_ref):
    beta = sc_ref[0]
    h = jnp.dot(x_ref[...], w_ref[...], preferred_element_type=jnp.float32)
    h = h + beta * oh_ref[...].astype(jnp.float32)
    h_ref[...] = h.astype(h_ref.dtype)


# -----------------------------------------------------------------------------
# Pass 2: spmm + scalar tail  out[i] = sum_j mask[i, j] @ H[j] + gamma
# -----------------------------------------------------------------------------
def _spmm_kernel(mask_ref, h_ref, sc_ref, out_ref):
    j = pl.program_id(1)

    # Output block index is constant along the contraction axis, so the block
    # stays VMEM-resident -> accumulate directly into it (no scratch needed).
    @pl.when(j == 0)
    def _init():
        out_ref[...] = jnp.zeros_like(out_ref)

    out_ref[...] += jnp.dot(mask_ref[...], h_ref[...],
                            preferred_element_type=jnp.float32)

    @pl.when(j == pl.num_programs(1) - 1)
    def _finalize():
        out_ref[...] += sc_ref[1]   # scalar tail: sum of non-positive alphas


def mixed_op_forward(mask_matrix, x, w_stack, one_hot_h, alphas, *,
                     one_hot_idx=ONE_HOT_IDX, max_tm=512, max_tn=2048,
                     compute_dtype=jnp.float32):
    """Pallas-backed MixedOp.forward.

    mask_matrix: (N, N) dense mask / adjacency
    x:           (N, in_dim) node features
    w_stack:     (K, in_dim, out_dim) per-op linear weights
    one_hot_h:   (N, out_dim) one-hot branch features
    alphas:      (K,) architecture weights
    returns:     (N, out_dim) f32

    `compute_dtype=jnp.bfloat16` halves the HBM traffic of the O(N^2) mask
    stream (accumulation stays f32); the test uses f32 for tight comparison.
    """
    N, in_dim = x.shape
    K, _, out_dim = w_stack.shape

    # ---- fold the K candidate branches (tiny, done once in the wrapper) ----
    alphas = alphas.astype(jnp.float32)
    is_oh = jnp.arange(K) == one_hot_idx
    pos = alphas > 0
    lin_coeff = jnp.where(pos & ~is_oh, alphas, 0.0)                   # (K,)
    w_eff = jnp.einsum("k,kio->io", lin_coeff,
                       w_stack.astype(jnp.float32), precision=_HP)     # (in,out)
    beta = jnp.sum(jnp.where(pos & is_oh, alphas, 0.0))                # one-hot coeff
    gamma = jnp.sum(jnp.where(pos, 0.0, alphas))                       # scalar tail
    scalars = jnp.stack([beta, gamma]).astype(jnp.float32)             # (2,) -> SMEM

    # ---- pad to tile-aligned, lane-dense shapes -----------------------------
    n_pad = _round_up(N, 256)
    in_pad = _round_up(in_dim, 128)
    out_pad = _round_up(out_dim, 128)
    tm = _pick_tile(n_pad, max_tm)    # spmm output-row tile
    tn = _pick_tile(n_pad, max_tn)    # spmm contraction tile
    tp = _pick_tile(n_pad, max_tm)    # projection row tile

    mask_p = jnp.pad(mask_matrix.astype(compute_dtype),
                     ((0, n_pad - N), (0, n_pad - N)))
    x_p = jnp.pad(x.astype(compute_dtype),
                  ((0, n_pad - N), (0, in_pad - in_dim)))
    oh_p = jnp.pad(one_hot_h.astype(compute_dtype),
                   ((0, n_pad - N), (0, out_pad - out_dim)))
    weff_p = jnp.pad(w_eff.astype(compute_dtype),
                     ((0, in_pad - in_dim), (0, out_pad - out_dim)))

    # ---- pass 1: H = x @ W_eff + beta * one_hot_h ----------------------------
    h = pl.pallas_call(
        _project_kernel,
        out_shape=jax.ShapeDtypeStruct((n_pad, out_pad), compute_dtype),
        grid_spec=pltpu.PrefetchScalarGridSpec(
            num_scalar_prefetch=0,
            grid=(n_pad // tp,),
            in_specs=[
                pl.BlockSpec((tp, in_pad), lambda i: (i, 0)),          # x rows
                pl.BlockSpec((in_pad, out_pad), lambda i: (0, 0)),     # W_eff (resident)
                pl.BlockSpec((tp, out_pad), lambda i: (i, 0)),         # one_hot_h rows
                pl.BlockSpec(memory_space=pltpu.SMEM),                 # [beta, gamma]
            ],
            out_specs=pl.BlockSpec((tp, out_pad), lambda i: (i, 0)),
        ),
        compiler_params=pltpu.CompilerParams(
            dimension_semantics=("parallel",)),
    )(x_p, weff_p, oh_p, scalars)

    # ---- pass 2: out = mask @ H + gamma --------------------------------------
    out = pl.pallas_call(
        _spmm_kernel,
        out_shape=jax.ShapeDtypeStruct((n_pad, out_pad), jnp.float32),
        grid_spec=pltpu.PrefetchScalarGridSpec(
            num_scalar_prefetch=0,
            grid=(n_pad // tm, n_pad // tn),
            in_specs=[
                pl.BlockSpec((tm, tn), lambda i, j: (i, j)),           # mask tile
                pl.BlockSpec((tn, out_pad), lambda i, j: (j, 0)),      # H rows
                pl.BlockSpec(memory_space=pltpu.SMEM),                 # [beta, gamma]
            ],
            out_specs=pl.BlockSpec((tm, out_pad), lambda i, j: (i, 0)),
        ),
        compiler_params=pltpu.CompilerParams(
            # row tiles independent (megacore-parallel); contraction axis last.
            dimension_semantics=("parallel", "arbitrary")),
    )(mask_p, h, scalars)

    return out[:N, :out_dim]


def mixed_op_reference(mask_matrix, x, w_stack, one_hot_h, alphas, *,
                       one_hot_idx=ONE_HOT_IDX):
    """Pure-JAX reference mirroring the PyTorch forward (per-k loop)."""
    N, _ = x.shape
    out_dim = w_stack.shape[-1]
    acc = jnp.zeros((N, out_dim), jnp.float32)
    for k in range(w_stack.shape[0]):
        w = alphas[k]
        h = one_hot_h if k == one_hot_idx else jnp.dot(x, w_stack[k], precision=_HP)
        z = jnp.dot(mask_matrix, h, precision=_HP)
        acc = acc + jnp.where(w > 0, w * z, w)
    return acc


if __name__ == "__main__":
    # small but tile-exercising shapes: N nodes, lane-dense feature dims.
    # N=640 pads to 768 -> projection grid (2,), spmm grid (2, 1) with
    # tm=tp=384, tn=768 (full contraction resident in VMEM).
    N, IN_DIM, OUT_DIM = 640, 128, 128

    key = jax.random.PRNGKey(0)
    k_mask, k_x, k_w, k_oh = jax.random.split(key, 4)

    # deterministic sparse-ish mask (densified), node features, op weights
    raw = jax.random.uniform(k_mask, (N, N))
    mask_matrix = jnp.where(raw > 0.7, raw, 0.0).astype(jnp.float32)
    x = jax.random.normal(k_x, (N, IN_DIM), dtype=jnp.float32)
    w_stack = (jax.random.normal(k_w, (NUM_OPS, IN_DIM, OUT_DIM),
                                 dtype=jnp.float32) * 0.1)
    # the 'one-hot' slot has no op (None in torch); zero its weights
    w_stack = w_stack.at[ONE_HOT_IDX].set(0.0)
    one_hot_h = jax.random.normal(k_oh, (N, OUT_DIM), dtype=jnp.float32)

    # architecture weights: mix of positive / zero / negative to hit both branches
    alphas = jnp.array([0.6, -0.2, 0.5, 0.0, 0.3], dtype=jnp.float32)

    fwd = jax.jit(mixed_op_forward)
    out = jax.block_until_ready(fwd(mask_matrix, x, w_stack, one_hot_h, alphas))

    ref = mixed_op_reference(mask_matrix, x, w_stack, one_hot_h, alphas)
    np.testing.assert_allclose(np.asarray(out), np.asarray(ref),
                               rtol=1e-3, atol=1e-3)
    print("KERNEL_OK")
</pallas_src>

<mosaic_0001>
module attributes {stable_mosaic.version = 11 : i64} {
  func.func @_spmm_kernel(%arg0: i32, %arg1: i32, %arg2: memref<384x768xf32, #tpu.memory_space<vmem>>, %arg3: memref<768x128xf32, #tpu.memory_space<vmem>>, %arg4: memref<2xf32, #tpu.memory_space<smem>>, %arg5: memref<384x128xf32, #tpu.memory_space<vmem>>) attributes {dimension_semantics = [#tpu.dimension_semantics<parallel>, #tpu.dimension_semantics<arbitrary>], iteration_bounds = array<i64: 2, 1>, scalar_prefetch = 0 : i64, scratch_operands = 0 : i64, tpu.core_type = #tpu.core_type<tc>, window_params = [{transform_indices = @transform_0, window_bounds = array<i64: 384, 768>}, {transform_indices = @transform_1, window_bounds = array<i64: 768, 128>}, {transform_indices = @transform_2, window_bounds = array<i64: 2>}, {transform_indices = @transform_3, window_bounds = array<i64: 384, 128>}]} {
    %c0_i32 = arith.constant 0 : i32
    %0 = arith.cmpi eq, %arg1, %c0_i32 : i32
    %1 = arith.extui %0 : i1 to i32
    %c0_i32_0 = arith.constant 0 : i32
    %2 = arith.cmpi ne, %1, %c0_i32_0 : i32
    scf.if %2 {
      %cst_10 = arith.constant 0.000000e+00 : f32
      %12 = vector.broadcast %cst_10 : f32 to vector<384x128xf32>
      %c0_11 = arith.constant 0 : index
      %c0_12 = arith.constant 0 : index
      %13 = vector.load %arg5[%c0_11, %c0_12] : memref<384x128xf32, #tpu.memory_space<vmem>>, vector<384x128xf32>
      tpu.vector_store %arg5[%c0_11, %c0_12], %12 {strides = array<i32>} : memref<384x128xf32, #tpu.memory_space<vmem>>, vector<384x128xf32>,
    } else {
    }
    %c0 = arith.constant 0 : index
    %c0_1 = arith.constant 0 : index
    %3 = vector.load %arg5[%c0, %c0_1] : memref<384x128xf32, #tpu.memory_space<vmem>>, vector<384x128xf32>
    %c0_2 = arith.constant 0 : index
    %c0_3 = arith.constant 0 : index
    %4 = vector.load %arg2[%c0_2, %c0_3] : memref<384x768xf32, #tpu.memory_space<vmem>>, vector<384x768xf32>
    %c0_4 = arith.constant 0 : index
    %c0_5 = arith.constant 0 : index
    %5 = vector.load %arg3[%c0_4, %c0_5] : memref<768x128xf32, #tpu.memory_space<vmem>>, vector<768x128xf32>
    %cst = arith.constant dense<0.000000e+00> : vector<384x128xf32>
    %6 = tpu.matmul %4, %5, %cst {dimension_numbers = #tpu.dot_dimension_numbers<[1], [0], [0], [1], [0, 0, 1, 1], [], []>} : vector<384x768xf32>, vector<768x128xf32>, vector<384x128xf32> -> vector<384x128xf32>
    %7 = arith.addf %3, %6 : vector<384x128xf32>
    %c0_6 = arith.constant 0 : index
    %c0_7 = arith.constant 0 : index
    %8 = vector.load %arg5[%c0_6, %c0_7] : memref<384x128xf32, #tpu.memory_space<vmem>>, vector<384x128xf32>
    tpu.vector_store %arg5[%c0_6, %c0_7], %7 {strides = array<i32>} : memref<384x128xf32, #tpu.memory_space<vmem>>, vector<384x128xf32>,
    %c0_i32_8 = arith.constant 0 : i32
    %9 = arith.cmpi eq, %arg1, %c0_i32_8 : i32
    %10 = arith.extui %9 : i1 to i32
    %c0_i32_9 = arith.constant 0 : i32
    %11 = arith.cmpi ne, %10, %c0_i32_9 : i32
    scf.if %11 {
      %c0_10 = arith.constant 0 : index
      %c0_11 = arith.constant 0 : index
      %12 = vector.load %arg5[%c0_10, %c0_11] : memref<384x128xf32, #tpu.memory_space<vmem>>, vector<384x128xf32>
      %c1 = arith.constant 1 : index
      %13 = memref.load %arg4[%c1] : memref<2xf32, #tpu.memory_space<smem>>
      %14 = vector.broadcast %13 : f32 to vector<384x128xf32>
      %15 = arith.addf %12, %14 : vector<384x128xf32>
      %c0_12 = arith.constant 0 : index
      %c0_13 = arith.constant 0 : index
      %16 = vector.load %arg5[%c0_12, %c0_13] : memref<384x128xf32, #tpu.memory_space<vmem>>, vector<384x128xf32>
      tpu.vector_store %arg5[%c0_12, %c0_13], %15 {strides = array<i32>} : memref<384x128xf32, #tpu.memory_space<vmem>>, vector<384x128xf32>,
    } else {
    }
    return
  }
  func.func @transform_0(%arg0: i32, %arg1: i32) -> (i32, i32) {
    %c0_i32 = arith.constant 0 : i32
    return %arg0, %arg1 : i32, i32
  }
  func.func @transform_1(%arg0: i32, %arg1: i32) -> (i32, i32) {
    %c0_i32 = arith.constant 0 : i32
    %c0_i32_0 = arith.constant 0 : i32
    return %arg1, %c0_i32 : i32, i32
  }
  func.func @transform_2(%arg0: i32, %arg1: i32) -> i32 {
    %c0_i32 = arith.constant 0 : i32
    %c0_i32_0 = arith.constant 0 : i32
    return %c0_i32 : i32
  }
  func.func @transform_3(%arg0: i32, %arg1: i32) -> (i32, i32) {
    %c0_i32 = arith.constant 0 : i32
    %c0_i32_0 = arith.constant 0 : i32
    return %arg0, %c0_i32 : i32, i32
  }
}

module attributes {stable_mosaic.version = 11 : i64} {
  func.func @_project_kernel(%arg0: i32, %arg1: memref<384x128xf32, #tpu.memory_space<vmem>>, %arg2: memref<128x128xf32, #tpu.memory_space<vmem>>, %arg3: memref<384x128xf32, #tpu.memory_space<vmem>>, %arg4: memref<2xf32, #tpu.memory_space<smem>>, %arg5: memref<384x128xf32, #tpu.memory_space<vmem>>) attributes {dimension_semantics = [#tpu.dimension_semantics<parallel>], iteration_bounds = array<i64: 2>, scalar_prefetch = 0 : i64, scratch_operands = 0 : i64, tpu.core_type = #tpu.core_type<tc>, window_params = [{transform_indices = @transform_0, window_bounds = array<i64: 384, 128>}, {pipeline_mode = #tpu.pipeline_mode<synchronous>, transform_indices = @transform_1, window_bounds = array<i64: 128, 128>}, {transform_indices = @transform_2, window_bounds = array<i64: 384, 128>}, {transform_indices = @transform_3, window_bounds = array<i64: 2>}, {transform_indices = @transform_4, window_bounds = array<i64: 384, 128>}]} {
    %c0 = arith.constant 0 : index
    %0 = memref.load %arg4[%c0] : memref<2xf32, #tpu.memory_space<smem>>
    %c0_0 = arith.constant 0 : index
    %c0_1 = arith.constant 0 : index
    %1 = vector.load %arg1[%c0_0, %c0_1] : memref<384x128xf32, #tpu.memory_space<vmem>>, vector<384x128xf32>
    %c0_2 = arith.constant 0 : index
    %c0_3 = arith.constant 0 : index
    %2 = vector.load %arg2[%c0_2, %c0_3] : memref<128x128xf32, #tpu.memory_space<vmem>>, vector<128x128xf32>
    %cst = arith.constant dense<0.000000e+00> : vector<384x128xf32>
    %3 = tpu.matmul %1, %2, %cst {dimension_numbers = #tpu.dot_dimension_numbers<[1], [0], [0], [1], [0, 0, 1, 1], [], []>} : vector<384x128xf32>, vector<128x128xf32>, vector<384x128xf32> -> vector<384x128xf32>
    %c0_4 = arith.constant 0 : index
    %c0_5 = arith.constant 0 : index
    %4 = vector.load %arg3[%c0_4, %c0_5] : memref<384x128xf32, #tpu.memory_space<vmem>>, vector<384x128xf32>
    %5 = vector.broadcast %0 : f32 to vector<384x128xf32>
    %6 = arith.mulf %5, %4 : vector<384x128xf32>
    %7 = arith.addf %3, %6 : vector<384x128xf32>
    %c0_6 = arith.constant 0 : index
    %c0_7 = arith.constant 0 : index
    %8 = vector.load %arg5[%c0_6, %c0_7] : memref<384x128xf32, #tpu.memory_space<vmem>>, vector<384x128xf32>
    tpu.vector_store %arg5[%c0_6, %c0_7], %7 {strides = array<i32>} : memref<384x128xf32, #tpu.memory_space<vmem>>, vector<384x128xf32>,
    return
  }
  func.func @transform_0(%arg0: i32) -> (i32, i32) {
    %c0_i32 = arith.constant 0 : i32
    %c0_i32_0 = arith.constant 0 : i32
    return %arg0, %c0_i32 : i32, i32
  }
  func.func @transform_1(%arg0: i32) -> (i32, i32) {
    %c0_i32 = arith.constant 0 : i32
    %c0_i32_0 = arith.constant 0 : i32
    %c0_i32_1 = arith.constant 0 : i32
    return %c0_i32, %c0_i32_0 : i32, i32
  }
  func.func @transform_2(%arg0: i32) -> (i32, i32) {
    %c0_i32 = arith.constant 0 : i32
    %c0_i32_0 = arith.constant 0 : i32
    return %arg0, %c0_i32 : i32, i32
  }
  func.func @transform_3(%arg0: i32) -> i32 {
    %c0_i32 = arith.constant 0 : i32
    %c0_i32_0 = arith.constant 0 : i32
    return %c0_i32 : i32
  }
  func.func @transform_4(%arg0: i32) -> (i32, i32) {
    %c0_i32 = arith.constant 0 : i32
    %c0_i32_0 = arith.constant 0 : i32
    return %arg0, %c0_i32 : i32, i32
  }
}

</mosaic_0001>

<bundles_post_ra>
// kernel: mixed_op_forward.2
= control target key start
LH: loop header
LB: loop body
LE: loop exit
PB: predicated region body
PF: predicated region fallthrough
CT: control target
= control target key end

     0   :  { %9 = vsyncpa [#allocation3], 0  ;;  %s1132_s15 = smov 0   ;;  %s1426_s0 = inlined_call_operand.vmem [shape: f32[768,128], index: 0, kind: input, shape index: {}]   ;;  %s1427_s1 = inlined_call_operand.vmem [shape: f32[128,128], index: 1, kind: input, shape index: {}]   ;;  %s1428_s2 = inlined_call_operand.vmem [shape: f32[768,128], index: 2, kind: input, shape index: {}]   ;;  %s1429_s3 = inlined_call_operand.vmem [shape: f32[2], index: 3, kind: input, shape index: {}]   ;;  %s1430_s4 = inlined_call_operand.vmem [shape: f32[768,128], index: 4, kind: output, shape index: {}]  }
   0x1 LB: > { %s832_s16 = sadd.s32 4294967295, %s1104_s15   ;;  %p834_p0 = scmp.ge.s32.totalorder %s1104_s15, 1  ;;  %s1104_s15 = sphi %s1132_s15, %s15_s15  }
   0x2   : > { %p140_p1 = scmp.lt.s32.totalorder %s1104_s15, 3  ;;  %s156_s19 = sshll.u32 %s1429_s3, 4  ;;  %s157_s19 = int_to_ptr.vmem [resolvable:$true] %s156_s19 }
   0x3   : > { %p1147_p3 = scmp.eq.s32.totalorder %s832_s16, 0  ;;  %s1079_s22 = scalar_lea.vmem %s157_s19, 16 }
   0x4   : > { %p1143_p2 = pnand %p834_p0, %p140_p1  ;;  %p1080_p6 = scmp.ne.s32.totalorder %s157_s19, %s1079_s22 }
   0x5   : > { %p1087_p10 = scmp.lt.s32.totalorder %s157_s19, %s157_s19  ;;  %p1088_p11 = scmp.lt.s32.totalorder %s1079_s22, %s1079_s22 }
   0x6   : > { %p1064_p4 = pneg %p1143_p2 }
   0x7   : > { %p1089_p12 = por %p1088_p11, %p1087_p10 }
   0x8   : > { %p1065_p5 = pnand %p1147_p3, %p1064_p4 }
   0xa   : > { %p1081_p7 = pneg %p1065_p5 }
   0xc   : > { %p1082_p8 = pnand %p1081_p7, %p1080_p6 }
   0xe   : > { %p1083_p9 = pneg %p1082_p8 }
  0x10   : > { %p1090_p13 = pnand %p1089_p12, %p1083_p9 }
  0x12   : > { %1093 = shalt.err (!%p1090_p13)
}
  0x13   : > { %s1106_s23 = smov [#allocation2]   ;;  %187 = sbr.rel (%p1143_p2) target bundleno = 324 (0x144), region = 36 }
  0x14   : > { %1067 = dma.vmem_to_smem (!%p1065_p5), %s157_s19, 16, %s1106_s23, [#allocation3]  }
  0x1a   : > { %1099 = dma.done.wait (%p1147_p3), [#allocation3], 16  }
  0x1b   : > { %1101 = vsyncadd (%p1147_p3), [#allocation3], 4294967280 }
  0x1c   : > { %193 = sfence }
  0x1d   : > { %v286_v0 = vld [vmem:[%s1427_s1] sm:$0xff]  ;;  %v287_v1 = vld [vmem:[%s1427_s1 + $0x8] sm:$0xff]  ;;  %v288_v2 = vld [vmem:[%s1427_s1 + $0x10] sm:$0xff]  ;;  %s219_s30 = smul.u32 48, %s832_s16  ;;  %s237_s10 = sld [smem:[#allocation2]] }
  0x1e   : > { %v1012_v3 = vpack.c.bf16 %v287_v1, %v286_v0  ;;  %v289_v4 = vld [vmem:[%s1427_s1 + $0x18] sm:$0xff]  ;;  %v290_v6 = vld [vmem:[%s1427_s1 + $0x20] sm:$0xff]  ;;  %v291_v7 = vld [vmem:[%s1427_s1 + $0x28] sm:$0xff] }
  0x1f   : > { %v1016_v5 = vpack.c.bf16 %v289_v4, %v288_v2  ;;  %p220_p0 = scmp.lt.s32.totalorder %s219_s30, 95  ;;  %v1020_v8 = vpack.c.bf16 %v291_v7, %v290_v6  ;;  %v292_v9 = vld [vmem:[%s1427_s1 + $0x30] sm:$0xff]  ;;  %v293_v10 = vld [vmem:[%s1427_s1 + $0x38] sm:$0xff]  ;;  %v294_v14 = vld [vmem:[%s1427_s1 + $0x40] sm:$0xff] }
  0x20   : > { %1013 = vmatprep.subr.bf16.mxu0 %v1012_v3  ;;  %1044 = vmatprep.subr.bf16.mxu1 %v1012_v3  ;;  %v1024_v13 = vpack.c.bf16 %v293_v10, %v292_v9  ;;  %v295_v15 = vld [vmem:[%s1427_s1 + $0x48] sm:$0xff]  ;;  %v296_v17 = vld [vmem:[%s1427_s1 + $0x50] sm:$0xff]  ;;  %v297_v18 = vld [vmem:[%s1427_s1 + $0x58] sm:$0xff] }
  0x21   : > { %1015 = vmatpush3.bf16.msra.mxu0 %v1012_v3  ;;  %1052 = vmatpush3.bf16.msra.mxu1 %v1012_v3  ;;  %s1434_s30 = smov (!%p220_p0, %s219_s30), 95  ;;  %v1028_v16 = vpack.c.bf16 %v295_v15, %v294_v14  ;;  %v1032_v19 = vpack.c.bf16 %v297_v18, %v296_v17  ;;  %v298_v20 = vld [vmem:[%s1427_s1 + $0x60] sm:$0xff]  ;;  %v299_v21 = vld [vmem:[%s1427_s1 + $0x68] sm:$0xff]  ;;  %v300_v23 = vld [vmem:[%s1427_s1 + $0x70] sm:$0xff] }
  0x22   : > { %1017 = vmatprep.subr.bf16.mxu0 %v1016_v5  ;;  %1045 = vmatprep.subr.bf16.mxu1 %v1016_v5  ;;  %s1185_s16 = sshll.u32 %s1434_s30, 3  ;;  %v1036_v22 = vpack.c.bf16 %v299_v21, %v298_v20  ;;  %v301_v24 = vld [vmem:[%s1427_s1 + $0x78] sm:$0xff] }
  0x23   : > { %s1191_s19 = scalar_lea.vmem %s1426_s0, %s1185_s16  ;;  %v1040_v25 = vpack.c.bf16 %v301_v24, %v300_v23  ;;  %s1269_s13 = scalar_lea.vmem %s1428_s2, %s1185_s16  ;;  %v1272_v9 = vstv %s237_s10 }
  0x24   : > { %v238_v11 = vld [vmem:[%s1191_s19] sm:$0xff]  ;;  %v239_v26 = vld [vmem:[%s1191_s19 + $0x8] sm:$0xff]  ;;  %v240_v28 = vld [vmem:[%s1191_s19 + $0x10] sm:$0xff]  ;;  %s1289_s18 = scalar_lea.vmem %s1430_s4, %s1185_s16 }
  0x25   : > { %1019 = vmatpush3.bf16.msra.mxu0 %v1016_v5  ;;  %1053 = vmatpush3.bf16.msra.mxu1 %v1016_v5  ;;  %v262_v12 = vld [vmem:[%s1191_s19 + $0xc0] sm:$0xff]  ;;  %v263_v27 = vld [vmem:[%s1191_s19 + $0xc8] sm:$0xff]  ;;  %v264_v29 = vld [vmem:[%s1191_s19 + $0xd0] sm:$0xff] }
  0x26   : > { %1021 = vmatprep.subr.bf16.mxu0 %v1020_v8  ;;  %1046 = vmatprep.subr.bf16.mxu1 %v1020_v8  ;;  %v241_v30 = vld [vmem:[%s1191_s19 + $0x18] sm:$0xff]  ;;  %v242_v32 = vld [vmem:[%s1191_s19 + $0x20] sm:$0xff]  ;;  %v243_v34 = vld [vmem:[%s1191_s19 + $0x28] sm:$0xff] }
  0x27   : > { %940 = vmatprep.mubr.f32.mxu0 %v238_v11  ;;  %976 = vmatprep.mubr.f32.mxu1 %v262_v12  ;;  %v265_v31 = vld [vmem:[%s1191_s19 + $0xd8] sm:$0xff]  ;;  %v266_v33 = vld [vmem:[%s1191_s19 + $0xe0] sm:$0xff]  ;;  %v267_v35 = vld [vmem:[%s1191_s19 + $0xe8] sm:$0xff] }
  0x28   : > { %v244_v36 = vld [vmem:[%s1191_s19 + $0x30] sm:$0xff]  ;;  %v245_v38 = vld [vmem:[%s1191_s19 + $0x38] sm:$0xff]  ;;  %v246_v40 = vld [vmem:[%s1191_s19 + $0x40] sm:$0xff] }
  0x29   : > { %1023 = vmatpush3.bf16.msra.mxu0 %v1020_v8  ;;  %1054 = vmatpush3.bf16.msra.mxu1 %v1020_v8  ;;  %v268_v37 = vld [vmem:[%s1191_s19 + $0xf0] sm:$0xff]  ;;  %v269_v39 = vld [vmem:[%s1191_s19 + $0xf8] sm:$0xff]  ;;  %v270_v41 = vld [vmem:[%s1191_s19 + $0x100] sm:$0xff] }
  0x2a   : > { %1025 = vmatprep.subr.bf16.mxu0 %v1024_v13  ;;  %1047 = vmatprep.subr.bf16.mxu1 %v1024_v13  ;;  %v247_v42 = vld [vmem:[%s1191_s19 + $0x48] sm:$0xff]  ;;  %v248_v44 = vld [vmem:[%s1191_s19 + $0x50] sm:$0xff]  ;;  %v249_v46 = vld [vmem:[%s1191_s19 + $0x58] sm:$0xff] }
  0x2b   : > { %v271_v43 = vld [vmem:[%s1191_s19 + $0x108] sm:$0xff]  ;;  %v272_v45 = vld [vmem:[%s1191_s19 + $0x110] sm:$0xff]  ;;  %v273_v47 = vld [vmem:[%s1191_s19 + $0x118] sm:$0xff] }
  0x2c   : > { %v250_v48 = vld [vmem:[%s1191_s19 + $0x60] sm:$0xff]  ;;  %v251_v50 = vld [vmem:[%s1191_s19 + $0x68] sm:$0xff]  ;;  %v252_v52 = vld [vmem:[%s1191_s19 + $0x70] sm:$0xff] }
  0x2d   : > { %1027 = vmatpush3.bf16.msra.mxu0 %v1024_v13  ;;  %1055 = vmatpush3.bf16.msra.mxu1 %v1024_v13  ;;  %v274_v49 = vld [vmem:[%s1191_s19 + $0x120] sm:$0xff]  ;;  %v275_v51 = vld [vmem:[%s1191_s19 + $0x128] sm:$0xff]  ;;  %v276_v53 = vld [vmem:[%s1191_s19 + $0x130] sm:$0xff] }
  0x2e   : > { %1029 = vmatprep.subr.bf16.mxu0 %v1028_v16  ;;  %1048 = vmatprep.subr.bf16.mxu1 %v1028_v16  ;;  %v253_v54 = vld [vmem:[%s1191_s19 + $0x78] sm:$0xff]  ;;  %v254_v56 = vld [vmem:[%s1191_s19 + $0x80] sm:$0xff]  ;;  %v255_v58 = vld [vmem:[%s1191_s19 + $0x88] sm:$0xff] }
  0x2f   : > { %v277_v55 = vld [vmem:[%s1191_s19 + $0x138] sm:$0xff]  ;;  %v278_v57 = vld [vmem:[%s1191_s19 + $0x140] sm:$0xff]  ;;  %v279_v59 = vld [vmem:[%s1191_s19 + $0x148] sm:$0xff] }
  0x30   : > { %v256_v60 = vld [vmem:[%s1191_s19 + $0x90] sm:$0xff]  ;;  %v257_v62 = vld [vmem:[%s1191_s19 + $0x98] sm:$0xff]  ;;  %v258_v0 = vld [vmem:[%s1191_s19 + $0xa0] sm:$0xff] }
  0x31   : > { %1031 = vmatpush3.bf16.msra.mxu0 %v1028_v16  ;;  %1056 = vmatpush3.bf16.msra.mxu1 %v1028_v16  ;;  %v280_v61 = vld [vmem:[%s1191_s19 + $0x150] sm:$0xff]  ;;  %v281_v63 = vld [vmem:[%s1191_s19 + $0x158] sm:$0xff]  ;;  %v282_v1 = vld [vmem:[%s1191_s19 + $0x160] sm:$0xff] }
  0x32   : > { %1033 = vmatprep.subr.bf16.mxu0 %v1032_v19  ;;  %1049 = vmatprep.subr.bf16.mxu1 %v1032_v19  ;;  %v259_v2 = vld [vmem:[%s1191_s19 + $0xa8] sm:$0xff]  ;;  %v260_v4 = vld [vmem:[%s1191_s19 + $0xb0] sm:$0xff]  ;;  %v261_v6 = vld [vmem:[%s1191_s19 + $0xb8] sm:$0xff] }
  0x33   : > { %v283_v3 = vld [vmem:[%s1191_s19 + $0x168] sm:$0xff]  ;;  %v284_v5 = vld [vmem:[%s1191_s19 + $0x170] sm:$0xff]  ;;  %v285_v7 = vld [vmem:[%s1191_s19 + $0x178] sm:$0xff] }
  0x34   : > { %v303_v8 = vld [vmem:[%s1269_s13 + $0x8] sm:$0xff]  ;;  %v302_v11 = vld [vmem:[%s1269_s13] sm:$0xff]  ;;  %v305_v17 = vld [vmem:[%s1269_s13 + $0x18] sm:$0xff] }
  0x35   : > { %1035 = vmatpush3.bf16.msra.mxu0 %v1032_v19  ;;  %1057 = vmatpush3.bf16.msra.mxu1 %v1032_v19  ;;  %v327_v10 = vld [vmem:[%s1269_s13 + $0xc8] sm:$0xff]  ;;  %v326_v12 = vld [vmem:[%s1269_s13 + $0xc0] sm:$0xff]  ;;  %v352_v13 = vmul.f32 %v1272_v9, %v303_v8  ;;  %v351_v15 = vmul.f32 %v1272_v9, %v302_v11  ;;  %v329_v18 = vld [vmem:[%s1269_s13 + $0xd8] sm:$0xff] }
  0x36   : > { %1037 = vmatprep.subr.bf16.mxu0 %v1036_v22  ;;  %1050 = vmatprep.subr.bf16.mxu1 %v1036_v22  ;;  %v376_v14 = vmul.f32 %v1272_v9, %v327_v10  ;;  %v375_v16 = vmul.f32 %v1272_v9, %v326_v12  ;;  %v304_v19 = vld [vmem:[%s1269_s13 + $0x10] sm:$0xff] }
  0x37   : > { %v328_v20 = vld [vmem:[%s1269_s13 + $0xd0] sm:$0xff] }
  0x39   : > { %1039 = vmatpush3.bf16.msra.mxu0 %v1036_v22  ;;  %1058 = vmatpush3.bf16.msra.mxu1 %v1036_v22 }
  0x3a   : > { %1041 = vmatprep.subr.bf16.mxu0 %v1040_v25  ;;  %1051 = vmatprep.subr.bf16.mxu1 %v1040_v25 }
  0x3d   : > { %1043 = vmatpush3.bf16.msra.mxu0 %v1040_v25  ;;  %1059 = vmatpush3.bf16.msra.mxu1 %v1040_v25 }
  0x40   : > { %941 = vmatmul.mubr.f32.vlgmr.msra.gmra.mrb[0].mxu0 %v239_v26  ;;  %977 = vmatmul.mubr.f32.vlgmr.msra.gmra.mrb[0].mxu1 %v263_v27  ;;  %v354_v27 = vmul.f32 %v1272_v9, %v305_v17 }
  0x41   : > { %943 = vmatprep.mubr.f32.mxu0 %v240_v28  ;;  %979 = vmatprep.mubr.f32.mxu1 %v264_v29  ;;  %v378_v28 = vmul.f32 %v1272_v9, %v329_v18  ;;  %v313_v18 = vld [vmem:[%s1269_s13 + $0x58] sm:$0xff] }
  0x44   : > { %944 = vmatmul.mubr.f32.gmra.mrb[2].mxu0 %v241_v30  ;;  %980 = vmatmul.mubr.f32.gmra.mrb[2].mxu1 %v265_v31  ;;  %v353_v31 = vmul.f32 %v1272_v9, %v304_v19  ;;  %v337_v19 = vld [vmem:[%s1269_s13 + $0x118] sm:$0xff] }
  0x45   : > { %946 = vmatprep.mubr.f32.mxu0 %v242_v32  ;;  %982 = vmatprep.mubr.f32.mxu1 %v266_v33  ;;  %v377_v32 = vmul.f32 %v1272_v9, %v328_v20  ;;  %v307_v33 = vld [vmem:[%s1269_s13 + $0x28] sm:$0xff]  ;;  %v312_v20 = vld [vmem:[%s1269_s13 + $0x50] sm:$0xff] }
  0x48   : > { %947 = vmatmul.mubr.f32.gmra.mrb[4].mxu0 %v243_v34  ;;  %983 = vmatmul.mubr.f32.gmra.mrb[4].mxu1 %v267_v35  ;;  %v331_v34 = vld [vmem:[%s1269_s13 + $0xe8] sm:$0xff]  ;;  %v306_v35 = vld [vmem:[%s1269_s13 + $0x20] sm:$0xff] }
  0x49   : > { %949 = vmatprep.mubr.f32.mxu0 %v244_v36  ;;  %985 = vmatprep.mubr.f32.mxu1 %v268_v37  ;;  %v330_v36 = vld [vmem:[%s1269_s13 + $0xe0] sm:$0xff] }
  0x4c   : > { %950 = vmatmul.mubr.f32.gmra.mrb[6].mxu0 %v245_v38  ;;  %986 = vmatmul.mubr.f32.gmra.mrb[6].mxu1 %v269_v39 }
  0x4d   : > { %952 = vmatprep.mubr.f32.mxu0 %v246_v40  ;;  %988 = vmatprep.mubr.f32.mxu1 %v270_v41 }
  0x50   : > { %953 = vmatmul.mubr.f32.gmra.mrb[8].mxu0 %v247_v42  ;;  %989 = vmatmul.mubr.f32.gmra.mrb[8].mxu1 %v271_v43  ;;  %v356_v43 = vmul.f32 %v1272_v9, %v307_v33 }
  0x51   : > { %955 = vmatprep.mubr.f32.mxu0 %v248_v44  ;;  %991 = vmatprep.mubr.f32.mxu1 %v272_v45  ;;  %v380_v44 = vmul.f32 %v1272_v9, %v331_v34  ;;  %v315_v34 = vld [vmem:[%s1269_s13 + $0x68] sm:$0xff] }
  0x54   : > { %956 = vmatmul.mubr.f32.gmra.mrb[10].mxu0 %v249_v46  ;;  %992 = vmatmul.mubr.f32.gmra.mrb[10].mxu1 %v273_v47  ;;  %v355_v47 = vmul.f32 %v1272_v9, %v306_v35  ;;  %v339_v35 = vld [vmem:[%s1269_s13 + $0x128] sm:$0xff] }
  0x55   : > { %958 = vmatprep.mubr.f32.mxu0 %v250_v48  ;;  %994 = vmatprep.mubr.f32.mxu1 %v274_v49  ;;  %v379_v48 = vmul.f32 %v1272_v9, %v330_v36  ;;  %v309_v49 = vld [vmem:[%s1269_s13 + $0x38] sm:$0xff]  ;;  %v314_v36 = vld [vmem:[%s1269_s13 + $0x60] sm:$0xff] }
  0x58   : > { %959 = vmatmul.mubr.f32.gmra.mrb[12].mxu0 %v251_v50  ;;  %995 = vmatmul.mubr.f32.gmra.mrb[12].mxu1 %v275_v51  ;;  %v333_v50 = vld [vmem:[%s1269_s13 + $0xf8] sm:$0xff]  ;;  %v308_v51 = vld [vmem:[%s1269_s13 + $0x30] sm:$0xff] }
  0x59   : > { %961 = vmatprep.mubr.f32.mxu0 %v252_v52  ;;  %997 = vmatprep.mubr.f32.mxu1 %v276_v53  ;;  %v332_v52 = vld [vmem:[%s1269_s13 + $0xf0] sm:$0xff] }
  0x5c   : > { %962 = vmatmul.mubr.f32.gmra.mrb[14].mxu0 %v253_v54  ;;  %998 = vmatmul.mubr.f32.gmra.mrb[14].mxu1 %v277_v55 }
  0x5d   : > { %964 = vmatprep.mubr.f32.mxu0 %v254_v56  ;;  %1000 = vmatprep.mubr.f32.mxu1 %v278_v57 }
  0x60   : > { %965 = vmatmul.mubr.f32.gmra.mrb[16].mxu0 %v255_v58  ;;  %1001 = vmatmul.mubr.f32.gmra.mrb[16].mxu1 %v279_v59  ;;  %v358_v59 = vmul.f32 %v1272_v9, %v309_v49 }
  0x61   : > { %967 = vmatprep.mubr.f32.mxu0 %v256_v60  ;;  %1003 = vmatprep.mubr.f32.mxu1 %v280_v61  ;;  %v382_v60 = vmul.f32 %v1272_v9, %v333_v50  ;;  %v317_v50 = vld [vmem:[%s1269_s13 + $0x78] sm:$0xff] }
  0x64   : > { %968 = vmatmul.mubr.f32.gmra.mrb[18].mxu0 %v257_v62  ;;  %1004 = vmatmul.mubr.f32.gmra.mrb[18].mxu1 %v281_v63  ;;  %v357_v63 = vmul.f32 %v1272_v9, %v308_v51  ;;  %v341_v51 = vld [vmem:[%s1269_s13 + $0x138] sm:$0xff] }
  0x65   : > { %970 = vmatprep.mubr.f32.mxu0 %v258_v0  ;;  %1006 = vmatprep.mubr.f32.mxu1 %v282_v1  ;;  %v381_v0 = vmul.f32 %v1272_v9, %v332_v52  ;;  %v311_v1 = vld [vmem:[%s1269_s13 + $0x48] sm:$0xff]  ;;  %v316_v52 = vld [vmem:[%s1269_s13 + $0x70] sm:$0xff] }
  0x66   : > { %v360_v12 = vmul.f32 %v1272_v9, %v311_v1 }
  0x68   : > { %971 = vmatmul.mubr.f32.gmra.mrb[20].mxu0 %v259_v2  ;;  %1007 = vmatmul.mubr.f32.gmra.mrb[20].mxu1 %v283_v3  ;;  %v335_v2 = vld [vmem:[%s1269_s13 + $0x108] sm:$0xff]  ;;  %v310_v3 = vld [vmem:[%s1269_s13 + $0x40] sm:$0xff] }
  0x69   : > { %973 = vmatprep.mubr.f32.mxu0 %v260_v4  ;;  %1009 = vmatprep.mubr.f32.mxu1 %v284_v5  ;;  %v334_v4 = vld [vmem:[%s1269_s13 + $0x100] sm:$0xff] }
  0x6a   : > { %v383_v17 = vmul.f32 %v1272_v9, %v334_v4  ;;  %v318_v4 = vld [vmem:[%s1269_s13 + $0x80] sm:$0xff] }
  0x6c   : > { %974 = vmatmul.mubr.f32.gmra.mrb[22].mxu0 %v261_v6  ;;  %1010 = vmatmul.mubr.f32.gmra.mrb[22].mxu1 %v285_v7 }
 0x113   : > { %v942_v21 = vpop.f32.mrb[0].mxu0  ;;  %v978_v22 = vpop.f32.mrb[0].mxu1 }
 0x114   : > { %v471_v23 = vadd.f32 %v942_v21, %v352_v13  ;;  %v591_v24 = vadd.f32 %v978_v22, %v376_v14  ;;  %v465_v25 = vpop.f32.mrb[1].mxu0  ;;  %v585_v26 = vpop.f32.mrb[1].mxu1  ;;  %v384_v13 = vmul.f32 %v1272_v9, %v335_v2  ;;  %v336_v21 = vld [vmem:[%s1269_s13 + $0x110] sm:$0xff]  ;;  %v319_v2 = vld [vmem:[%s1269_s13 + $0x88] sm:$0xff] }
 0x115   : > { %v466_v29 = vadd.f32 %v465_v25, %v351_v15  ;;  %v586_v30 = vadd.f32 %v585_v26, %v375_v16  ;;  %v359_v16 = vmul.f32 %v1272_v9, %v310_v3  ;;  %v385_v33 = vmul.f32 %v1272_v9, %v336_v21  ;;  %v343_v3 = vld [vmem:[%s1269_s13 + $0x148] sm:$0xff]  ;;  %v320_v21 = vld [vmem:[%s1269_s13 + $0x90] sm:$0xff] }
 0x116   : > { %705 = vst [vmem:[%s1289_s18 + $0x8] sm:$0xff] %v471_v23  ;;  %729 = vst [vmem:[%s1289_s18 + $0xc8] sm:$0xff] %v591_v24 }
 0x117   : > { %704 = vst [vmem:[%s1289_s18] sm:$0xff] %v466_v29  ;;  %728 = vst [vmem:[%s1289_s18 + $0xc0] sm:$0xff] %v586_v30  ;;  %v945_v37 = vpop.f32.mrb[2].mxu0  ;;  %v981_v38 = vpop.f32.mrb[2].mxu1  ;;  %v386_v29 = vmul.f32 %v1272_v9, %v337_v19  ;;  %v321_v19 = vld [vmem:[%s1269_s13 + $0x98] sm:$0xff] }
 0x118   : > { %v481_v39 = vadd.f32 %v945_v37, %v354_v27  ;;  %v601_v40 = vadd.f32 %v981_v38, %v378_v28  ;;  %v475_v41 = vpop.f32.mrb[3].mxu0  ;;  %v595_v42 = vpop.f32.mrb[3].mxu1  ;;  %v362_v28 = vmul.f32 %v1272_v9, %v313_v18  ;;  %v338_v37 = vld [vmem:[%s1269_s13 + $0x120] sm:$0xff] }
 0x119   : > { %v476_v45 = vadd.f32 %v475_v41, %v353_v31  ;;  %v596_v46 = vadd.f32 %v595_v42, %v377_v32  ;;  %v361_v32 = vmul.f32 %v1272_v9, %v312_v20  ;;  %v387_v49 = vmul.f32 %v1272_v9, %v338_v37  ;;  %v345_v20 = vld [vmem:[%s1269_s13 + $0x158] sm:$0xff]  ;;  %v322_v37 = vld [vmem:[%s1269_s13 + $0xa0] sm:$0xff] }
 0x11a   : > { %707 = vst [vmem:[%s1289_s18 + $0x18] sm:$0xff] %v481_v39  ;;  %731 = vst [vmem:[%s1289_s18 + $0xd8] sm:$0xff] %v601_v40 }
 0x11b   : > { %706 = vst [vmem:[%s1289_s18 + $0x10] sm:$0xff] %v476_v45  ;;  %730 = vst [vmem:[%s1289_s18 + $0xd0] sm:$0xff] %v596_v46  ;;  %v948_v53 = vpop.f32.mrb[4].mxu0  ;;  %v984_v54 = vpop.f32.mrb[4].mxu1  ;;  %v388_v45 = vmul.f32 %v1272_v9, %v339_v35  ;;  %v323_v35 = vld [vmem:[%s1269_s13 + $0xa8] sm:$0xff] }
 0x11c   : > { %v491_v55 = vadd.f32 %v948_v53, %v356_v43  ;;  %v611_v56 = vadd.f32 %v984_v54, %v380_v44  ;;  %v485_v57 = vpop.f32.mrb[5].mxu0  ;;  %v605_v58 = vpop.f32.mrb[5].mxu1  ;;  %v364_v44 = vmul.f32 %v1272_v9, %v315_v34  ;;  %v340_v53 = vld [vmem:[%s1269_s13 + $0x130] sm:$0xff] }
 0x11d   : > { %v486_v61 = vadd.f32 %v485_v57, %v355_v47  ;;  %v606_v62 = vadd.f32 %v605_v58, %v379_v48  ;;  %v363_v48 = vmul.f32 %v1272_v9, %v314_v36  ;;  %v389_v1 = vmul.f32 %v1272_v9, %v340_v53  ;;  %v347_v36 = vld [vmem:[%s1269_s13 + $0x168] sm:$0xff]  ;;  %v324_v53 = vld [vmem:[%s1269_s13 + $0xb0] sm:$0xff] }
 0x11e   : > { %709 = vst [vmem:[%s1289_s18 + $0x28] sm:$0xff] %v491_v55  ;;  %733 = vst [vmem:[%s1289_s18 + $0xe8] sm:$0xff] %v611_v56 }
 0x11f   : > { %708 = vst [vmem:[%s1289_s18 + $0x20] sm:$0xff] %v486_v61  ;;  %732 = vst [vmem:[%s1289_s18 + $0xe0] sm:$0xff] %v606_v62  ;;  %v951_v5 = vpop.f32.mrb[6].mxu0  ;;  %v987_v6 = vpop.f32.mrb[6].mxu1  ;;  %v390_v61 = vmul.f32 %v1272_v9, %v341_v51  ;;  %v325_v51 = vld [vmem:[%s1269_s13 + $0xb8] sm:$0xff] }
 0x120   : > { %v501_v7 = vadd.f32 %v951_v5, %v358_v59  ;;  %v621_v8 = vadd.f32 %v987_v6, %v382_v60  ;;  %v495_v10 = vpop.f32.mrb[7].mxu0  ;;  %v615_v11 = vpop.f32.mrb[7].mxu1  ;;  %v366_v60 = vmul.f32 %v1272_v9, %v317_v50  ;;  %v342_v5 = vld [vmem:[%s1269_s13 + $0x140] sm:$0xff] }
 0x121   : > { %v496_v14 = vadd.f32 %v495_v10, %v357_v63  ;;  %v616_v15 = vadd.f32 %v615_v11, %v381_v0  ;;  %v365_v0 = vmul.f32 %v1272_v9, %v316_v52  ;;  %v391_v18 = vmul.f32 %v1272_v9, %v342_v5  ;;  %v349_v52 = vld [vmem:[%s1269_s13 + $0x178] sm:$0xff] }
 0x122   : > { %711 = vst [vmem:[%s1289_s18 + $0x38] sm:$0xff] %v501_v7  ;;  %735 = vst [vmem:[%s1289_s18 + $0xf8] sm:$0xff] %v621_v8 }
 0x123   : > { %710 = vst [vmem:[%s1289_s18 + $0x30] sm:$0xff] %v496_v14  ;;  %734 = vst [vmem:[%s1289_s18 + $0xf0] sm:$0xff] %v616_v15  ;;  %v954_v22 = vpop.f32.mrb[8].mxu0  ;;  %v990_v23 = vpop.f32.mrb[8].mxu1  ;;  %v392_v14 = vmul.f32 %v1272_v9, %v343_v3 }
 0x124   : > { %v511_v24 = vadd.f32 %v954_v22, %v360_v12  ;;  %v631_v25 = vadd.f32 %v990_v23, %v384_v13  ;;  %v505_v26 = vpop.f32.mrb[9].mxu0  ;;  %v625_v27 = vpop.f32.mrb[9].mxu1  ;;  %v368_v13 = vmul.f32 %v1272_v9, %v319_v2  ;;  %v344_v22 = vld [vmem:[%s1269_s13 + $0x150] sm:$0xff] }
 0x125   : > { %v506_v30 = vadd.f32 %v505_v26, %v359_v16  ;;  %v626_v31 = vadd.f32 %v625_v27, %v383_v17  ;;  %v367_v17 = vmul.f32 %v1272_v9, %v318_v4  ;;  %v393_v34 = vmul.f32 %v1272_v9, %v344_v22 }
 0x126   : > { %713 = vst [vmem:[%s1289_s18 + $0x48] sm:$0xff] %v511_v24  ;;  %737 = vst [vmem:[%s1289_s18 + $0x108] sm:$0xff] %v631_v25 }
 0x127   : > { %712 = vst [vmem:[%s1289_s18 + $0x40] sm:$0xff] %v506_v30  ;;  %736 = vst [vmem:[%s1289_s18 + $0x100] sm:$0xff] %v626_v31  ;;  %v957_v38 = vpop.f32.mrb[10].mxu0  ;;  %v993_v39 = vpop.f32.mrb[10].mxu1  ;;  %v394_v30 = vmul.f32 %v1272_v9, %v345_v20 }
 0x128   : > { %v521_v40 = vadd.f32 %v957_v38, %v362_v28  ;;  %v641_v41 = vadd.f32 %v993_v39, %v386_v29  ;;  %v515_v42 = vpop.f32.mrb[11].mxu0  ;;  %v635_v43 = vpop.f32.mrb[11].mxu1  ;;  %v370_v29 = vmul.f32 %v1272_v9, %v321_v19  ;;  %v346_v38 = vld [vmem:[%s1269_s13 + $0x160] sm:$0xff] }
 0x129   : > { %v516_v46 = vadd.f32 %v515_v42, %v361_v32  ;;  %v636_v47 = vadd.f32 %v635_v43, %v385_v33  ;;  %v369_v33 = vmul.f32 %v1272_v9, %v320_v21  ;;  %v395_v50 = vmul.f32 %v1272_v9, %v346_v38 }
 0x12a   : > { %715 = vst [vmem:[%s1289_s18 + $0x58] sm:$0xff] %v521_v40  ;;  %739 = vst [vmem:[%s1289_s18 + $0x118] sm:$0xff] %v641_v41 }
 0x12b   : > { %714 = vst [vmem:[%s1289_s18 + $0x50] sm:$0xff] %v516_v46  ;;  %738 = vst [vmem:[%s1289_s18 + $0x110] sm:$0xff] %v636_v47  ;;  %v960_v54 = vpop.f32.mrb[12].mxu0  ;;  %v996_v55 = vpop.f32.mrb[12].mxu1  ;;  %v396_v46 = vmul.f32 %v1272_v9, %v347_v36 }
 0x12c   : > { %v531_v56 = vadd.f32 %v960_v54, %v364_v44  ;;  %v651_v57 = vadd.f32 %v996_v55, %v388_v45  ;;  %v525_v58 = vpop.f32.mrb[13].mxu0  ;;  %v645_v59 = vpop.f32.mrb[13].mxu1  ;;  %v372_v45 = vmul.f32 %v1272_v9, %v323_v35  ;;  %v348_v54 = vld [vmem:[%s1269_s13 + $0x170] sm:$0xff] }
 0x12d   : > { %v526_v62 = vadd.f32 %v525_v58, %v363_v48  ;;  %v646_v63 = vadd.f32 %v645_v59, %v387_v49  ;;  %v371_v49 = vmul.f32 %v1272_v9, %v322_v37  ;;  %v397_v2 = vmul.f32 %v1272_v9, %v348_v54 }
 0x12e   : > { %717 = vst [vmem:[%s1289_s18 + $0x68] sm:$0xff] %v531_v56  ;;  %741 = vst [vmem:[%s1289_s18 + $0x128] sm:$0xff] %v651_v57 }
 0x12f   : > { %716 = vst [vmem:[%s1289_s18 + $0x60] sm:$0xff] %v526_v62  ;;  %740 = vst [vmem:[%s1289_s18 + $0x120] sm:$0xff] %v646_v63  ;;  %v963_v6 = vpop.f32.mrb[14].mxu0  ;;  %v999_v7 = vpop.f32.mrb[14].mxu1  ;;  %v398_v62 = vmul.f32 %v1272_v9, %v349_v52 }
 0x130   : > { %v541_v8 = vadd.f32 %v963_v6, %v366_v60  ;;  %v661_v10 = vadd.f32 %v999_v7, %v390_v61  ;;  %v535_v11 = vpop.f32.mrb[15].mxu0  ;;  %v655_v12 = vpop.f32.mrb[15].mxu1  ;;  %v374_v61 = vmul.f32 %v1272_v9, %v325_v51 }
 0x131   : > { %v536_v15 = vadd.f32 %v535_v11, %v365_v0  ;;  %v656_v16 = vadd.f32 %v655_v12, %v389_v1  ;;  %v373_v1 = vmul.f32 %v1272_v9, %v324_v53 }
 0x132   : > { %719 = vst [vmem:[%s1289_s18 + $0x78] sm:$0xff] %v541_v8  ;;  %743 = vst [vmem:[%s1289_s18 + $0x138] sm:$0xff] %v661_v10 }
 0x133   : > { %718 = vst [vmem:[%s1289_s18 + $0x70] sm:$0xff] %v536_v15  ;;  %742 = vst [vmem:[%s1289_s18 + $0x130] sm:$0xff] %v656_v16  ;;  %v966_v23 = vpop.f32.mrb[16].mxu0  ;;  %v1002_v24 = vpop.f32.mrb[16].mxu1 }
 0x134   : > { %v551_v25 = vadd.f32 %v966_v23, %v368_v13  ;;  %v671_v26 = vadd.f32 %v1002_v24, %v392_v14  ;;  %v545_v27 = vpop.f32.mrb[17].mxu0  ;;  %v665_v28 = vpop.f32.mrb[17].mxu1 }
 0x135   : > { %v546_v31 = vadd.f32 %v545_v27, %v367_v17  ;;  %v666_v32 = vadd.f32 %v665_v28, %v391_v18 }
 0x136   : > { %721 = vst [vmem:[%s1289_s18 + $0x88] sm:$0xff] %v551_v25  ;;  %745 = vst [vmem:[%s1289_s18 + $0x148] sm:$0xff] %v671_v26 }
 0x137   : > { %720 = vst [vmem:[%s1289_s18 + $0x80] sm:$0xff] %v546_v31  ;;  %744 = vst [vmem:[%s1289_s18 + $0x140] sm:$0xff] %v666_v32  ;;  %v969_v39 = vpop.f32.mrb[18].mxu0  ;;  %v1005_v40 = vpop.f32.mrb[18].mxu1 }
 0x138   : > { %v561_v41 = vadd.f32 %v969_v39, %v370_v29  ;;  %v681_v42 = vadd.f32 %v1005_v40, %v394_v30  ;;  %v555_v43 = vpop.f32.mrb[19].mxu0  ;;  %v675_v44 = vpop.f32.mrb[19].mxu1 }
 0x139   : > { %v556_v47 = vadd.f32 %v555_v43, %v369_v33  ;;  %v676_v48 = vadd.f32 %v675_v44, %v393_v34 }
 0x13a   : > { %723 = vst [vmem:[%s1289_s18 + $0x98] sm:$0xff] %v561_v41  ;;  %747 = vst [vmem:[%s1289_s18 + $0x158] sm:$0xff] %v681_v42 }
 0x13b   : > { %722 = vst [vmem:[%s1289_s18 + $0x90] sm:$0xff] %v556_v47  ;;  %746 = vst [vmem:[%s1289_s18 + $0x150] sm:$0xff] %v676_v48  ;;  %v972_v55 = vpop.f32.mrb[20].mxu0  ;;  %v1008_v56 = vpop.f32.mrb[20].mxu1 }
 0x13c   : > { %v571_v57 = vadd.f32 %v972_v55, %v372_v45  ;;  %v691_v58 = vadd.f32 %v1008_v56, %v396_v46  ;;  %v565_v59 = vpop.f32.mrb[21].mxu0  ;;  %v685_v60 = vpop.f32.mrb[21].mxu1 }
 0x13d   : > { %v566_v63 = vadd.f32 %v565_v59, %v371_v49  ;;  %v686_v0 = vadd.f32 %v685_v60, %v395_v50 }
 0x13e   : > { %725 = vst [vmem:[%s1289_s18 + $0xa8] sm:$0xff] %v571_v57  ;;  %749 = vst [vmem:[%s1289_s18 + $0x168] sm:$0xff] %v691_v58 }
 0x13f   : > { %724 = vst [vmem:[%s1289_s18 + $0xa0] sm:$0xff] %v566_v63  ;;  %748 = vst [vmem:[%s1289_s18 + $0x160] sm:$0xff] %v686_v0  ;;  %v975_v3 = vpop.f32.mrb[22].mxu0  ;;  %v1011_v4 = vpop.f32.mrb[22].mxu1 }
 0x140   : > { %v581_v5 = vadd.f32 %v975_v3, %v374_v61  ;;  %v701_v6 = vadd.f32 %v1011_v4, %v398_v62  ;;  %v575_v7 = vpop.f32.mrb[23].mxu0  ;;  %v695_v8 = vpop.f32.mrb[23].mxu1 }
 0x141   : > { %v576_v10 = vadd.f32 %v575_v7, %v373_v1  ;;  %v696_v11 = vadd.f32 %v695_v8, %v397_v2 }
 0x142   : > { %727 = vst [vmem:[%s1289_s18 + $0xb8] sm:$0xff] %v581_v5  ;;  %751 = vst [vmem:[%s1289_s18 + $0x178] sm:$0xff] %v701_v6 }
 0x143   : > { %726 = vst [vmem:[%s1289_s18 + $0xb0] sm:$0xff] %v576_v10  ;;  %750 = vst [vmem:[%s1289_s18 + $0x170] sm:$0xff] %v696_v11 }
 0x144 PF: > { %s15_s15 = sadd.s32 1, %s1104_s15  }
 0x145   : > { %p12_p1 = scmp.ge.s32.totalorder %s15_s15, 4  }
 0x147   :  { %14 = sbr.rel (!%p12_p1) target bundleno = 1 (0x1), region = 74 }
 0x14e   :  { %774 = vsyncpa [#allocation3], 1 }
 0x14f   :  { %776 = vsyncpa [#allocation3 + $0x1], 1 }

// kernel: mixed_op_forward.3
= control target key start
LH: loop header
LB: loop body
LE: loop exit
PB: predicated region body
PF: predicated region fallthrough
CT: control target
= control target key end

     0   :  { %8 = vsyncpa [#allocation3], 0  ;;  %s2275_s12 = smov 0   ;;  %s2277_s13 = smov 0   ;;  %s3223_s0 = inlined_call_operand.vmem [shape: f32[768,768], index: 0, kind: input, shape index: {}]   ;;  %s3224_s1 = inlined_call_operand.vmem [shape: f32[768,128], index: 1, kind: input, shape index: {}]   ;;  %s3225_s2 = inlined_call_operand.vmem [shape: f32[2], index: 2, kind: input, shape index: {}]   ;;  %s3226_s3 = inlined_call_operand.vmem [shape: f32[768,128], index: 3, kind: output, shape index: {}]  }
   0x1   :  { %s2279_s14 = smov 0  }
   0x2 LB: > { %s1983_s15 = sadd.s32 4294967295, %s2251_s14   ;;  %s26_s16 = sadd.s32 1, %s2247_s13  ;;  %s2251_s14 = sphi %s2279_s14, %s14_s14   ;;  %s2247_s13 = sphi %s2277_s13, %s3230_s13   ;;  %s2243_s12 = sphi %s2275_s12, %s3229_s12  }
   0x3   : > { %p28_p0 = scmp.ge.s32.totalorder %s26_s16, 2  ;;  %p1985_p1 = scmp.ge.s32.totalorder %s2251_s14, 1 }
   0x4   : > { %p132_p2 = scmp.lt.s32.totalorder %s2251_s14, 3  ;;  %p2300_p4 = scmp.eq.s32.totalorder %s1983_s15, 0 }
   0x5   : > { %s3232_s16 = smov (%p28_p0, %s26_s16), 0  ;;  %s154_s21 = sshll.u32 %s3225_s2, 4  ;;  %s155_s21 = int_to_ptr.vmem [resolvable:$true] %s154_s21 }
   0x6   : > { %p2296_p3 = pnand %p1985_p1, %p132_p2  ;;  %s2210_s22 = scalar_lea.vmem %s155_s21, 16 }
   0x7   : > { %p2211_p7 = scmp.ne.s32.totalorder %s155_s21, %s2210_s22  ;;  %p2218_p11 = scmp.lt.s32.totalorder %s155_s21, %s155_s21 }
   0x8   : > { %p2177_p5 = pneg %p2296_p3  ;;  %p2219_p12 = scmp.lt.s32.totalorder %s2210_s22, %s2210_s22 }
   0xa   : > { %p2178_p6 = pnand %p2300_p4, %p2177_p5  ;;  %p2220_p13 = por %p2219_p12, %p2218_p11 }
   0xc   : > { %p2212_p8 = pneg %p2178_p6 }
   0xe   : > { %p2213_p9 = pnand %p2212_p8, %p2211_p7 }
  0x10   : > { %p2214_p10 = pneg %p2213_p9 }
  0x12   : > { %p2221_p0 = pnand %p2220_p13, %p2214_p10 }
  0x14   : > { %2224 = shalt.err (!%p2221_p0)
}
  0x15   : > { %s2253_s23 = smov [#allocation2]   ;;  %182 = sbr.rel (%p2296_p3) target bundleno = 600 (0x258), region = 32 }
  0x16   : > { %2180 = dma.vmem_to_smem (!%p2178_p6), %s155_s21, 16, %s2253_s23, [#allocation3]  }
  0x1c   : > { %2238 = dma.done.wait (%p2300_p4), [#allocation3], 16  }
  0x1d   : > { %2240 = vsyncadd (%p2300_p4), [#allocation3], 4294967280 }
  0x1e   : > { %188 = sfence }
  0x1f   : > { %v629_v0 = vld [vmem:[%s3224_s1] sm:$0xff]  ;;  %v630_v1 = vld [vmem:[%s3224_s1 + $0x8] sm:$0xff]  ;;  %v631_v2 = vld [vmem:[%s3224_s1 + $0x10] sm:$0xff]  ;;  %s217_s30 = smul.u32 48, %s2243_s12  ;;  %v2254_v3 = vmov 0.0|0.0  }
  0x20   : > { %2140 = vmatprep.subr.bf16.mxu1 %v2254_v3  ;;  %v1997_v4 = vpack.c.bf16 %v630_v1, %v629_v0  ;;  %1996 = vmatprep.subr.bf16.mxu0 %v2254_v3  ;;  %v632_v5 = vld [vmem:[%s3224_s1 + $0x18] sm:$0xff]  ;;  %v633_v7 = vld [vmem:[%s3224_s1 + $0x20] sm:$0xff]  ;;  %v634_v8 = vld [vmem:[%s3224_s1 + $0x28] sm:$0xff] }
  0x21   : > { %p219_p1 = scmp.lt.s32.totalorder %s217_s30, 95  ;;  %v2000_v6 = vpack.c.bf16 %v632_v5, %v631_v2  ;;  %v2003_v9 = vpack.c.bf16 %v634_v8, %v633_v7  ;;  %v635_v10 = vld [vmem:[%s3224_s1 + $0x30] sm:$0xff]  ;;  %v636_v11 = vld [vmem:[%s3224_s1 + $0x38] sm:$0xff]  ;;  %v637_v15 = vld [vmem:[%s3224_s1 + $0x40] sm:$0xff] }
  0x22   : > { %2156 = vmatpush1.bf16.msra.mxu1 %v1997_v4  ;;  %1998 = vmatpush1.bf16.msra.mxu0 %v1997_v4  ;;  %v2006_v13 = vpack.c.bf16 %v636_v11, %v635_v10  ;;  %v638_v16 = vld [vmem:[%s3224_s1 + $0x48] sm:$0xff]  ;;  %v639_v18 = vld [vmem:[%s3224_s1 + $0x50] sm:$0xff]  ;;  %v640_v19 = vld [vmem:[%s3224_s1 + $0x58] sm:$0xff] }
  0x23   : > { %2141 = vmatprep.subr.bf16.mxu1 %v2254_v3  ;;  %1999 = vmatprep.subr.bf16.mxu0 %v2254_v3  ;;  %s3234_s30 = smov (!%p219_p1, %s217_s30), 95  ;;  %v2009_v17 = vpack.c.bf16 %v638_v16, %v637_v15  ;;  %v2012_v20 = vpack.c.bf16 %v640_v19, %v639_v18  ;;  %v641_v21 = vld [vmem:[%s3224_s1 + $0x60] sm:$0xff]  ;;  %v642_v22 = vld [vmem:[%s3224_s1 + $0x68] sm:$0xff]  ;;  %v643_v24 = vld [vmem:[%s3224_s1 + $0x70] sm:$0xff] }
  0x24   : > { %s2172_s10 = smul.u32 48, %s3234_s30  ;;  %v2015_v23 = vpack.c.bf16 %v642_v22, %v641_v21  ;;  %v644_v25 = vld [vmem:[%s3224_s1 + $0x78] sm:$0xff]  ;;  %v645_v27 = vld [vmem:[%s3224_s1 + $0x80] sm:$0xff]  ;;  %v646_v28 = vld [vmem:[%s3224_s1 + $0x88] sm:$0xff]  ;;  %s1992_s21 = sshll.u32 %s3234_s30, 3 }
  0x25   : > { %v2018_v26 = vpack.c.bf16 %v644_v25, %v643_v24  ;;  %v2021_v29 = vpack.c.bf16 %v646_v28, %v645_v27  ;;  %v647_v30 = vld [vmem:[%s3224_s1 + $0x90] sm:$0xff]  ;;  %v648_v31 = vld [vmem:[%s3224_s1 + $0x98] sm:$0xff]  ;;  %v649_v33 = vld [vmem:[%s3224_s1 + $0xa0] sm:$0xff]  ;;  %s3070_s24 = scalar_lea.vmem %s3226_s3, %s1992_s21 }
  0x26   : > { %2157 = vmatpush1.bf16.msra.mxu1 %v2000_v6  ;;  %2001 = vmatpush1.bf16.msra.mxu0 %v2000_v6  ;;  %s2354_s20 = scalar_lea.vmem %s3223_s0, %s2172_s10  ;;  %v2024_v32 = vpack.c.bf16 %v648_v31, %v647_v30  ;;  %v650_v34 = vld [vmem:[%s3224_s1 + $0xa8] sm:$0xff]  ;;  %v651_v36 = vld [vmem:[%s3224_s1 + $0xb0] sm:$0xff]  ;;  %v652_v37 = vld [vmem:[%s3224_s1 + $0xb8] sm:$0xff] }
  0x27   : > { %2142 = vmatprep.subr.bf16.mxu1 %v2254_v3  ;;  %2002 = vmatprep.subr.bf16.mxu0 %v2254_v3  ;;  %v486_v12 = vld [vmem:[%s2354_s20 + $0x488] sm:$0xff]  ;;  %v2027_v35 = vpack.c.bf16 %v650_v34, %v649_v33  ;;  %v2030_v38 = vpack.c.bf16 %v652_v37, %v651_v36  ;;  %v653_v39 = vld [vmem:[%s3224_s1 + $0xc0] sm:$0xff]  ;;  %v655_v42 = vld [vmem:[%s3224_s1 + $0xd0] sm:$0xff] }
  0x28   : > { %v342_v14 = vld [vmem:[%s2354_s20 + $0x8] sm:$0xff]  ;;  %909 = vmatprep.mubr.f32.mxu1 %v486_v12  ;;  %v656_v43 = vld [vmem:[%s3224_s1 + $0xd8] sm:$0xff]  ;;  %v657_v45 = vld [vmem:[%s3224_s1 + $0xe0] sm:$0xff] }
  0x29   : > { %789 = vmatprep.mubr.f32.mxu0 %v342_v14  ;;  %v654_v40 = vld [vmem:[%s3224_s1 + $0xc8] sm:$0xff]  ;;  %v2036_v44 = vpack.c.bf16 %v656_v43, %v655_v42  ;;  %v659_v48 = vld [vmem:[%s3224_s1 + $0xf0] sm:$0xff]  ;;  %v660_v49 = vld [vmem:[%s3224_s1 + $0xf8] sm:$0xff] }
  0x2a   : > { %2158 = vmatpush1.bf16.msra.mxu1 %v2003_v9  ;;  %2004 = vmatpush1.bf16.msra.mxu0 %v2003_v9  ;;  %v2033_v41 = vpack.c.bf16 %v654_v40, %v653_v39  ;;  %v658_v46 = vld [vmem:[%s3224_s1 + $0xe8] sm:$0xff]  ;;  %v2042_v50 = vpack.c.bf16 %v660_v49, %v659_v48  ;;  %v661_v51 = vld [vmem:[%s3224_s1 + $0x100] sm:$0xff]  ;;  %v492_v58 = vld [vmem:[%s2354_s20 + $0x4b8] sm:$0xff] }
  0x2b   : > { %2143 = vmatprep.subr.bf16.mxu1 %v2254_v3  ;;  %2005 = vmatprep.subr.bf16.mxu0 %v2254_v3  ;;  %v2039_v47 = vpack.c.bf16 %v658_v46, %v657_v45  ;;  %v662_v52 = vld [vmem:[%s3224_s1 + $0x108] sm:$0xff]  ;;  %v693_v53 = vld [vmem:[%s3224_s1 + $0x200] sm:$0xff]  ;;  %v663_v60 = vld [vmem:[%s3224_s1 + $0x110] sm:$0xff] }
  0x2c   : > { %v694_v54 = vld [vmem:[%s3224_s1 + $0x208] sm:$0xff]  ;;  %v485_v55 = vld [vmem:[%s2354_s20 + $0x480] sm:$0xff]  ;;  %v2045_v56 = vpack.c.bf16 %v662_v52, %v661_v51  ;;  %v664_v61 = vld [vmem:[%s3224_s1 + $0x118] sm:$0xff] }
  0x2d   : > { %v341_v57 = vld [vmem:[%s2354_s20] sm:$0xff]  ;;  %v2093_v59 = vpack.c.bf16 %v694_v54, %v693_v53  ;;  %v348_v62 = vld [vmem:[%s2354_s20 + $0x38] sm:$0xff]  ;;  %v695_v63 = vld [vmem:[%s3224_s1 + $0x210] sm:$0xff]  ;;  %v2048_v4 = vpack.c.bf16 %v664_v61, %v663_v60 }
  0x2e   : > { %2159 = vmatpush1.bf16.msra.mxu1 %v2006_v13  ;;  %2007 = vmatpush1.bf16.msra.mxu0 %v2006_v13  ;;  %v696_v0 = vld [vmem:[%s3224_s1 + $0x218] sm:$0xff]  ;;  %v491_v1 = vld [vmem:[%s2354_s20 + $0x4b0] sm:$0xff]  ;;  %v498_v5 = vld [vmem:[%s2354_s20 + $0x4e8] sm:$0xff] }
  0x2f   : > { %2144 = vmatprep.subr.bf16.mxu1 %v2254_v3  ;;  %2008 = vmatprep.subr.bf16.mxu0 %v2254_v3  ;;  %v347_v2 = vld [vmem:[%s2354_s20 + $0x30] sm:$0xff]  ;;  %v354_v6 = vld [vmem:[%s2354_s20 + $0x68] sm:$0xff]  ;;  %v2096_v7 = vpack.c.bf16 %v696_v0, %v695_v63  ;;  %v665_v8 = vld [vmem:[%s3224_s1 + $0x120] sm:$0xff] }
  0x30   : > { %v666_v9 = vld [vmem:[%s3224_s1 + $0x128] sm:$0xff]  ;;  %v697_v10 = vld [vmem:[%s3224_s1 + $0x220] sm:$0xff]  ;;  %v504_v14 = vld [vmem:[%s2354_s20 + $0x518] sm:$0xff] }
  0x31   : > { %v698_v11 = vld [vmem:[%s3224_s1 + $0x228] sm:$0xff]  ;;  %v497_v12 = vld [vmem:[%s2354_s20 + $0x4e0] sm:$0xff]  ;;  %v360_v15 = vld [vmem:[%s2354_s20 + $0x98] sm:$0xff]  ;;  %v2051_v16 = vpack.c.bf16 %v666_v9, %v665_v8 }
  0x32   : > { %2160 = vmatpush1.bf16.msra.mxu1 %v2009_v17  ;;  %2010 = vmatpush1.bf16.msra.mxu0 %v2009_v17  ;;  %v353_v13 = vld [vmem:[%s2354_s20 + $0x60] sm:$0xff]  ;;  %v2099_v17 = vpack.c.bf16 %v698_v11, %v697_v10  ;;  %v667_v18 = vld [vmem:[%s3224_s1 + $0x130] sm:$0xff]  ;;  %v668_v19 = vld [vmem:[%s3224_s1 + $0x138] sm:$0xff] }
  0x33   : > { %2145 = vmatprep.subr.bf16.mxu1 %v2254_v3  ;;  %2011 = vmatprep.subr.bf16.mxu0 %v2254_v3  ;;  %v700_v21 = vld [vmem:[%s3224_s1 + $0x238] sm:$0xff]  ;;  %v503_v22 = vld [vmem:[%s2354_s20 + $0x510] sm:$0xff]  ;;  %v510_v24 = vld [vmem:[%s2354_s20 + $0x548] sm:$0xff] }
  0x34   : > { %v366_v25 = vld [vmem:[%s2354_s20 + $0xc8] sm:$0xff]  ;;  %v669_v28 = vld [vmem:[%s3224_s1 + $0x140] sm:$0xff]  ;;  %v516_v34 = vld [vmem:[%s2354_s20 + $0x578] sm:$0xff] }
  0x35   : > { %v701_v30 = vld [vmem:[%s3224_s1 + $0x240] sm:$0xff]  ;;  %v702_v31 = vld [vmem:[%s3224_s1 + $0x248] sm:$0xff]  ;;  %v672_v39 = vld [vmem:[%s3224_s1 + $0x158] sm:$0xff] }
  0x36   : > { %2161 = vmatpush1.bf16.msra.mxu1 %v2012_v20  ;;  %2013 = vmatpush1.bf16.msra.mxu0 %v2012_v20  ;;  %v699_v20 = vld [vmem:[%s3224_s1 + $0x230] sm:$0xff]  ;;  %v365_v33 = vld [vmem:[%s2354_s20 + $0xc0] sm:$0xff]  ;;  %v2105_v37 = vpack.c.bf16 %v702_v31, %v701_v30  ;;  %v378_v45 = vld [vmem:[%s2354_s20 + $0x128] sm:$0xff] }
  0x37   : > { %2146 = vmatprep.subr.bf16.mxu1 %v2254_v3  ;;  %2014 = vmatprep.subr.bf16.mxu0 %v2254_v3  ;;  %v2102_v27 = vpack.c.bf16 %v700_v21, %v699_v20  ;;  %v703_v40 = vld [vmem:[%s3224_s1 + $0x250] sm:$0xff]  ;;  %v673_v48 = vld [vmem:[%s3224_s1 + $0x160] sm:$0xff]  ;;  %v674_v49 = vld [vmem:[%s3224_s1 + $0x168] sm:$0xff] }
  0x38   : > { %v515_v42 = vld [vmem:[%s2354_s20 + $0x570] sm:$0xff]  ;;  %v706_v51 = vld [vmem:[%s3224_s1 + $0x268] sm:$0xff]  ;;  %v521_v52 = vld [vmem:[%s2354_s20 + $0x5a0] sm:$0xff] }
  0x39   : > { %v371_v43 = vld [vmem:[%s2354_s20 + $0xf0] sm:$0xff]  ;;  %v377_v53 = vld [vmem:[%s2354_s20 + $0x120] sm:$0xff]  ;;  %v528_v54 = vld [vmem:[%s2354_s20 + $0x5d8] sm:$0xff] }
  0x3a   : > { %2162 = vmatpush1.bf16.msra.mxu1 %v2015_v23  ;;  %2016 = vmatpush1.bf16.msra.mxu0 %v2015_v23  ;;  %v359_v23 = vld [vmem:[%s2354_s20 + $0x90] sm:$0xff]  ;;  %v708_v61 = vld [vmem:[%s3224_s1 + $0x278] sm:$0xff]  ;;  %v534_v0 = vld [vmem:[%s2354_s20 + $0x608] sm:$0xff] }
  0x3b   : > { %2147 = vmatprep.subr.bf16.mxu1 %v2254_v3  ;;  %2017 = vmatprep.subr.bf16.mxu0 %v2254_v3  ;;  %v707_v60 = vld [vmem:[%s3224_s1 + $0x270] sm:$0xff]  ;;  %v710_v8 = vld [vmem:[%s3224_s1 + $0x288] sm:$0xff]  ;;  %v533_v9 = vld [vmem:[%s2354_s20 + $0x600] sm:$0xff] }
  0x3c   : > { %v383_v63 = vld [vmem:[%s2354_s20 + $0x150] sm:$0xff]  ;;  %v389_v10 = vld [vmem:[%s2354_s20 + $0x180] sm:$0xff]  ;;  %v540_v11 = vld [vmem:[%s2354_s20 + $0x638] sm:$0xff] }
  0x3d   : > { %v395_v20 = vld [vmem:[%s2354_s20 + $0x1b0] sm:$0xff]  ;;  %v546_v21 = vld [vmem:[%s2354_s20 + $0x668] sm:$0xff]  ;;  %v401_v30 = vld [vmem:[%s2354_s20 + $0x1e0] sm:$0xff] }
  0x3e   : > { %2163 = vmatpush1.bf16.msra.mxu1 %v2018_v26  ;;  %2019 = vmatpush1.bf16.msra.mxu0 %v2018_v26  ;;  %v2054_v26 = vpack.c.bf16 %v668_v19, %v667_v18  ;;  %v712_v18 = vld [vmem:[%s3224_s1 + $0x298] sm:$0xff]  ;;  %v539_v19 = vld [vmem:[%s2354_s20 + $0x630] sm:$0xff] }
  0x3f   : > { %2148 = vmatprep.subr.bf16.mxu1 %v2254_v3  ;;  %2020 = vmatprep.subr.bf16.mxu0 %v2254_v3  ;;  %v552_v31 = vld [vmem:[%s2354_s20 + $0x698] sm:$0xff] }
  0x42   : > { %2164 = vmatpush1.bf16.msra.mxu1 %v2021_v29  ;;  %2022 = vmatpush1.bf16.msra.mxu0 %v2021_v29  ;;  %v670_v29 = vld [vmem:[%s3224_s1 + $0x148] sm:$0xff] }
  0x43   : > { %2149 = vmatprep.subr.bf16.mxu1 %v2254_v3  ;;  %2023 = vmatprep.subr.bf16.mxu0 %v2254_v3  ;;  %v2057_v36 = vpack.c.bf16 %v670_v29, %v669_v28  ;;  %v714_v28 = vld [vmem:[%s3224_s1 + $0x2a8] sm:$0xff]  ;;  %v545_v29 = vld [vmem:[%s2354_s20 + $0x660] sm:$0xff] }
  0x46   : > { %2165 = vmatpush1.bf16.msra.mxu1 %v2024_v32  ;;  %2025 = vmatpush1.bf16.msra.mxu0 %v2024_v32  ;;  %v509_v32 = vld [vmem:[%s2354_s20 + $0x540] sm:$0xff] }
  0x47   : > { %2150 = vmatprep.subr.bf16.mxu1 %v2254_v3  ;;  %2026 = vmatprep.subr.bf16.mxu0 %v2254_v3 }
  0x4a   : > { %2166 = vmatpush1.bf16.msra.mxu1 %v2027_v35  ;;  %2028 = vmatpush1.bf16.msra.mxu0 %v2027_v35  ;;  %v372_v35 = vld [vmem:[%s2354_s20 + $0xf8] sm:$0xff] }
  0x4b   : > { %2151 = vmatprep.subr.bf16.mxu1 %v2254_v3  ;;  %2029 = vmatprep.subr.bf16.mxu0 %v2254_v3 }
  0x4e   : > { %2167 = vmatpush1.bf16.msra.mxu1 %v2030_v38  ;;  %2031 = vmatpush1.bf16.msra.mxu0 %v2030_v38  ;;  %v671_v38 = vld [vmem:[%s3224_s1 + $0x150] sm:$0xff] }
  0x4f   : > { %2152 = vmatprep.subr.bf16.mxu1 %v2254_v3  ;;  %2032 = vmatprep.subr.bf16.mxu0 %v2254_v3  ;;  %v2060_v46 = vpack.c.bf16 %v672_v39, %v671_v38  ;;  %v716_v38 = vld [vmem:[%s3224_s1 + $0x2b8] sm:$0xff]  ;;  %v551_v39 = vld [vmem:[%s2354_s20 + $0x690] sm:$0xff] }
  0x52   : > { %2168 = vmatpush1.bf16.msra.mxu1 %v2033_v41  ;;  %2034 = vmatpush1.bf16.msra.mxu0 %v2033_v41  ;;  %v704_v41 = vld [vmem:[%s3224_s1 + $0x258] sm:$0xff] }
  0x53   : > { %2153 = vmatprep.subr.bf16.mxu1 %v2254_v3  ;;  %2035 = vmatprep.subr.bf16.mxu0 %v2254_v3 }
  0x56   : > { %2169 = vmatpush1.bf16.msra.mxu1 %v2036_v44  ;;  %2037 = vmatpush1.bf16.msra.mxu0 %v2036_v44  ;;  %v522_v44 = vld [vmem:[%s2354_s20 + $0x5a8] sm:$0xff] }
  0x57   : > { %2154 = vmatprep.subr.bf16.mxu1 %v2254_v3  ;;  %2038 = vmatprep.subr.bf16.mxu0 %v2254_v3 }
  0x5a   : > { %2170 = vmatpush1.bf16.msra.mxu1 %v2039_v47  ;;  %2040 = vmatpush1.bf16.msra.mxu0 %v2039_v47  ;;  %v2108_v47 = vpack.c.bf16 %v704_v41, %v703_v40  ;;  %v407_v40 = vld [vmem:[%s2354_s20 + $0x210] sm:$0xff]  ;;  %v558_v41 = vld [vmem:[%s2354_s20 + $0x6c8] sm:$0xff] }
  0x5b   : > { %2155 = vmatprep.subr.bf16.mxu1 %v2254_v3  ;;  %2041 = vmatprep.subr.bf16.mxu0 %v2254_v3 }
  0x5e   : > { %2171 = vmatpush1.bf16.msra.mxu1 %v2042_v50  ;;  %2043 = vmatpush1.bf16.msra.mxu0 %v2042_v50  ;;  %v705_v50 = vld [vmem:[%s3224_s1 + $0x260] sm:$0xff] }
  0x5f   : > { %2044 = vmatprep.subr.bf16.mxu1 %v2254_v3  ;;  %2092 = vmatprep.subr.bf16.mxu0 %v2254_v3 }
  0x61   : > { %910 = vmatmul.mubr.f32.vlgmr.msra.gmra.mrb[0].mxu1 %v485_v55  ;;  %790 = vmatmul.mubr.f32.vlgmr.msra.gmra.mrb[0].mxu0 %v341_v57  ;;  %v384_v55 = vld [vmem:[%s2354_s20 + $0x158] sm:$0xff]  ;;  %v2111_v57 = vpack.c.bf16 %v706_v51, %v705_v50  ;;  %v413_v50 = vld [vmem:[%s2354_s20 + $0x240] sm:$0xff] }
  0x62   : > { %2046 = vmatpush1.bf16.msra.mxu1 %v2045_v56  ;;  %914 = vmatprep.mubr.f32.mxu1 %v492_v58  ;;  %v2063_v56 = vpack.c.bf16 %v674_v49, %v673_v48  ;;  %v675_v58 = vld [vmem:[%s3224_s1 + $0x170] sm:$0xff]  ;;  %v718_v48 = vld [vmem:[%s3224_s1 + $0x2c8] sm:$0xff]  ;;  %v557_v49 = vld [vmem:[%s2354_s20 + $0x6c0] sm:$0xff] }
  0x63   : > { %2094 = vmatpush1.bf16.msra.mxu0 %v2093_v59  ;;  %794 = vmatprep.mubr.f32.mxu0 %v348_v62  ;;  %v676_v59 = vld [vmem:[%s3224_s1 + $0x178] sm:$0xff]  ;;  %v527_v62 = vld [vmem:[%s2354_s20 + $0x5d0] sm:$0xff] }
  0x64   : > { %2047 = vmatprep.subr.bf16.mxu1 %v2254_v3  ;;  %2095 = vmatprep.subr.bf16.mxu0 %v2254_v3  ;;  %v564_v51 = vld [vmem:[%s2354_s20 + $0x6f8] sm:$0xff] }
  0x65   : > { %915 = vmatmul.mubr.f32.gmra.mrb[2].mxu1 %v491_v1  ;;  %795 = vmatmul.mubr.f32.gmra.mrb[2].mxu0 %v347_v2  ;;  %v390_v1 = vld [vmem:[%s2354_s20 + $0x188] sm:$0xff]  ;;  %v2066_v2 = vpack.c.bf16 %v676_v59, %v675_v58  ;;  %v720_v58 = vld [vmem:[%s3224_s1 + $0x2d8] sm:$0xff]  ;;  %v563_v59 = vld [vmem:[%s2354_s20 + $0x6f0] sm:$0xff] }
  0x66   : > { %919 = vmatprep.mubr.f32.mxu1 %v498_v5  ;;  %2049 = vmatpush1.bf16.msra.mxu1 %v2048_v4  ;;  %v2114_v4 = vpack.c.bf16 %v708_v61, %v707_v60  ;;  %v677_v5 = vld [vmem:[%s3224_s1 + $0x180] sm:$0xff]  ;;  %v419_v60 = vld [vmem:[%s2354_s20 + $0x270] sm:$0xff]  ;;  %v570_v61 = vld [vmem:[%s2354_s20 + $0x728] sm:$0xff] }
  0x67   : > { %799 = vmatprep.mubr.f32.mxu0 %v354_v6  ;;  %2097 = vmatpush1.bf16.msra.mxu0 %v2096_v7  ;;  %v678_v6 = vld [vmem:[%s3224_s1 + $0x188] sm:$0xff]  ;;  %v709_v7 = vld [vmem:[%s3224_s1 + $0x280] sm:$0xff] }
  0x68   : > { %2050 = vmatprep.subr.bf16.mxu1 %v2254_v3  ;;  %2098 = vmatprep.subr.bf16.mxu0 %v2254_v3 }
  0x69   : > { %920 = vmatmul.mubr.f32.gmra.mrb[4].mxu1 %v497_v12  ;;  %800 = vmatmul.mubr.f32.gmra.mrb[4].mxu0 %v353_v13  ;;  %v396_v12 = vld [vmem:[%s2354_s20 + $0x1b8] sm:$0xff]  ;;  %v2069_v13 = vpack.c.bf16 %v678_v6, %v677_v5  ;;  %v722_v5 = vld [vmem:[%s3224_s1 + $0x2e8] sm:$0xff]  ;;  %v569_v6 = vld [vmem:[%s2354_s20 + $0x720] sm:$0xff] }
  0x6a   : > { %924 = vmatprep.mubr.f32.mxu1 %v504_v14  ;;  %804 = vmatprep.mubr.f32.mxu0 %v360_v15  ;;  %v2117_v14 = vpack.c.bf16 %v710_v8, %v709_v7  ;;  %v679_v15 = vld [vmem:[%s3224_s1 + $0x190] sm:$0xff]  ;;  %v425_v7 = vld [vmem:[%s2354_s20 + $0x2a0] sm:$0xff]  ;;  %v576_v8 = vld [vmem:[%s2354_s20 + $0x758] sm:$0xff] }
  0x6b   : > { %2052 = vmatpush1.bf16.msra.mxu1 %v2051_v16  ;;  %2100 = vmatpush1.bf16.msra.mxu0 %v2099_v17  ;;  %v680_v16 = vld [vmem:[%s3224_s1 + $0x198] sm:$0xff]  ;;  %v711_v17 = vld [vmem:[%s3224_s1 + $0x290] sm:$0xff] }
  0x6c   : > { %2053 = vmatprep.subr.bf16.mxu1 %v2254_v3  ;;  %2101 = vmatprep.subr.bf16.mxu0 %v2254_v3 }
  0x6d   : > { %925 = vmatmul.mubr.f32.gmra.mrb[6].mxu1 %v503_v22  ;;  %805 = vmatmul.mubr.f32.gmra.mrb[6].mxu0 %v359_v23  ;;  %v402_v22 = vld [vmem:[%s2354_s20 + $0x1e8] sm:$0xff]  ;;  %v2072_v23 = vpack.c.bf16 %v680_v16, %v679_v15  ;;  %v724_v15 = vld [vmem:[%s3224_s1 + $0x2f8] sm:$0xff]  ;;  %v575_v16 = vld [vmem:[%s2354_s20 + $0x750] sm:$0xff] }
  0x6e   : > { %929 = vmatprep.mubr.f32.mxu1 %v510_v24  ;;  %809 = vmatprep.mubr.f32.mxu0 %v366_v25  ;;  %v2120_v24 = vpack.c.bf16 %v712_v18, %v711_v17  ;;  %v681_v25 = vld [vmem:[%s3224_s1 + $0x1a0] sm:$0xff]  ;;  %v431_v17 = vld [vmem:[%s2354_s20 + $0x2d0] sm:$0xff]  ;;  %v582_v18 = vld [vmem:[%s2354_s20 + $0x788] sm:$0xff] }
  0x6f   : > { %2055 = vmatpush1.bf16.msra.mxu1 %v2054_v26  ;;  %2103 = vmatpush1.bf16.msra.mxu0 %v2102_v27  ;;  %v682_v26 = vld [vmem:[%s3224_s1 + $0x1a8] sm:$0xff]  ;;  %v713_v27 = vld [vmem:[%s3224_s1 + $0x2a0] sm:$0xff] }
  0x70   : > { %2056 = vmatprep.subr.bf16.mxu1 %v2254_v3  ;;  %2104 = vmatprep.subr.bf16.mxu0 %v2254_v3 }
  0x71   : > { %930 = vmatmul.mubr.f32.gmra.mrb[8].mxu1 %v509_v32  ;;  %810 = vmatmul.mubr.f32.gmra.mrb[8].mxu0 %v365_v33  ;;  %v408_v32 = vld [vmem:[%s2354_s20 + $0x218] sm:$0xff]  ;;  %v2075_v33 = vpack.c.bf16 %v682_v26, %v681_v25  ;;  %v443_v26 = vld [vmem:[%s2354_s20 + $0x330] sm:$0xff] }
  0x72   : > { %934 = vmatprep.mubr.f32.mxu1 %v516_v34  ;;  %814 = vmatprep.mubr.f32.mxu0 %v372_v35  ;;  %v2123_v34 = vpack.c.bf16 %v714_v28, %v713_v27  ;;  %v683_v35 = vld [vmem:[%s3224_s1 + $0x1b0] sm:$0xff]  ;;  %v444_v25 = vld [vmem:[%s2354_s20 + $0x338] sm:$0xff]  ;;  %v594_v27 = vld [vmem:[%s2354_s20 + $0x7e8] sm:$0xff] }
  0x73   : > { %2058 = vmatpush1.bf16.msra.mxu1 %v2057_v36  ;;  %2106 = vmatpush1.bf16.msra.mxu0 %v2105_v37  ;;  %v684_v36 = vld [vmem:[%s3224_s1 + $0x1b8] sm:$0xff]  ;;  %v715_v37 = vld [vmem:[%s3224_s1 + $0x2b0] sm:$0xff]  ;;  %v450_v28 = vld [vmem:[%s2354_s20 + $0x368] sm:$0xff] }
  0x74   : > { %2059 = vmatprep.subr.bf16.mxu1 %v2254_v3  ;;  %2107 = vmatprep.subr.bf16.mxu0 %v2254_v3 }
  0x75   : > { %935 = vmatmul.mubr.f32.gmra.mrb[10].mxu1 %v515_v42  ;;  %815 = vmatmul.mubr.f32.gmra.mrb[10].mxu0 %v371_v43  ;;  %v414_v42 = vld [vmem:[%s2354_s20 + $0x248] sm:$0xff]  ;;  %v2078_v43 = vpack.c.bf16 %v684_v36, %v683_v35 }
  0x76   : > { %939 = vmatprep.mubr.f32.mxu1 %v522_v44  ;;  %819 = vmatprep.mubr.f32.mxu0 %v378_v45  ;;  %v2126_v44 = vpack.c.bf16 %v716_v38, %v715_v37  ;;  %v685_v45 = vld [vmem:[%s3224_s1 + $0x1c0] sm:$0xff]  ;;  %v606_v35 = vld [vmem:[%s2354_s20 + $0x848] sm:$0xff] }
  0x77   : > { %2061 = vmatpush1.bf16.msra.mxu1 %v2060_v46  ;;  %2109 = vmatpush1.bf16.msra.mxu0 %v2108_v47  ;;  %v686_v46 = vld [vmem:[%s3224_s1 + $0x1c8] sm:$0xff]  ;;  %v717_v47 = vld [vmem:[%s3224_s1 + $0x2c0] sm:$0xff] }
  0x78   : > { %2062 = vmatprep.subr.bf16.mxu1 %v2254_v3  ;;  %2110 = vmatprep.subr.bf16.mxu0 %v2254_v3  ;;  %v462_v36 = vld [vmem:[%s2354_s20 + $0x3c8] sm:$0xff]  ;;  %v605_v37 = vld [vmem:[%s2354_s20 + $0x840] sm:$0xff] }
  0x79   : > { %940 = vmatmul.mubr.f32.gmra.mrb[12].mxu1 %v521_v52  ;;  %820 = vmatmul.mubr.f32.gmra.mrb[12].mxu0 %v377_v53  ;;  %v420_v52 = vld [vmem:[%s2354_s20 + $0x278] sm:$0xff]  ;;  %v2081_v53 = vpack.c.bf16 %v686_v46, %v685_v45  ;;  %v461_v38 = vld [vmem:[%s2354_s20 + $0x3c0] sm:$0xff] }
  0x7a   : > { %944 = vmatprep.mubr.f32.mxu1 %v528_v54  ;;  %824 = vmatprep.mubr.f32.mxu0 %v384_v55  ;;  %v2129_v54 = vpack.c.bf16 %v718_v48, %v717_v47  ;;  %v687_v55 = vld [vmem:[%s3224_s1 + $0x1d0] sm:$0xff]  ;;  %v617_v45 = vld [vmem:[%s2354_s20 + $0x8a0] sm:$0xff]  ;;  %v624_v47 = vld [vmem:[%s2354_s20 + $0x8d8] sm:$0xff] }
  0x7b   : > { %2064 = vmatpush1.bf16.msra.mxu1 %v2063_v56  ;;  %2112 = vmatpush1.bf16.msra.mxu0 %v2111_v57  ;;  %v688_v56 = vld [vmem:[%s3224_s1 + $0x1d8] sm:$0xff]  ;;  %v719_v57 = vld [vmem:[%s3224_s1 + $0x2d0] sm:$0xff]  ;;  %v473_v46 = vld [vmem:[%s2354_s20 + $0x420] sm:$0xff] }
  0x7c   : > { %2065 = vmatprep.subr.bf16.mxu1 %v2254_v3  ;;  %2113 = vmatprep.subr.bf16.mxu0 %v2254_v3  ;;  %v480_v48 = vld [vmem:[%s2354_s20 + $0x458] sm:$0xff] }
  0x7d   : > { %945 = vmatmul.mubr.f32.gmra.mrb[14].mxu1 %v527_v62  ;;  %825 = vmatmul.mubr.f32.gmra.mrb[14].mxu0 %v383_v63  ;;  %v426_v62 = vld [vmem:[%s2354_s20 + $0x2a8] sm:$0xff]  ;;  %v2084_v63 = vpack.c.bf16 %v688_v56, %v687_v55  ;;  %v352_v56 = vld [vmem:[%s2354_s20 + $0x58] sm:$0xff] }
  0x7e   : > { %949 = vmatprep.mubr.f32.mxu1 %v534_v0  ;;  %829 = vmatprep.mubr.f32.mxu0 %v390_v1  ;;  %v2132_v0 = vpack.c.bf16 %v720_v58, %v719_v57  ;;  %v689_v1 = vld [vmem:[%s3224_s1 + $0x1e0] sm:$0xff]  ;;  %v350_v55 = vld [vmem:[%s2354_s20 + $0x48] sm:$0xff]  ;;  %v351_v58 = vld [vmem:[%s2354_s20 + $0x50] sm:$0xff] }
  0x7f   : > { %2067 = vmatpush1.bf16.msra.mxu1 %v2066_v2  ;;  %2115 = vmatpush1.bf16.msra.mxu0 %v2114_v4  ;;  %v690_v2 = vld [vmem:[%s3224_s1 + $0x1e8] sm:$0xff]  ;;  %v721_v4 = vld [vmem:[%s3224_s1 + $0x2e0] sm:$0xff] }
  0x80   : > { %2068 = vmatprep.subr.bf16.mxu1 %v2254_v3  ;;  %2116 = vmatprep.subr.bf16.mxu0 %v2254_v3  ;;  %v349_v57 = vld [vmem:[%s2354_s20 + $0x40] sm:$0xff] }
  0x81   : > { %950 = vmatmul.mubr.f32.gmra.mrb[16].mxu1 %v533_v9  ;;  %830 = vmatmul.mubr.f32.gmra.mrb[16].mxu0 %v389_v10  ;;  %v432_v9 = vld [vmem:[%s2354_s20 + $0x2d8] sm:$0xff]  ;;  %v2087_v10 = vpack.c.bf16 %v690_v2, %v689_v1  ;;  %v361_v1 = vld [vmem:[%s2354_s20 + $0xa0] sm:$0xff]  ;;  %v363_v2 = vld [vmem:[%s2354_s20 + $0xb0] sm:$0xff] }
  0x82   : > { %954 = vmatprep.mubr.f32.mxu1 %v540_v11  ;;  %834 = vmatprep.mubr.f32.mxu0 %v396_v12  ;;  %v2135_v11 = vpack.c.bf16 %v722_v5, %v721_v4  ;;  %v691_v12 = vld [vmem:[%s3224_s1 + $0x1f0] sm:$0xff]  ;;  %v368_v4 = vld [vmem:[%s2354_s20 + $0xd8] sm:$0xff]  ;;  %v370_v5 = vld [vmem:[%s2354_s20 + $0xe8] sm:$0xff] }
  0x83   : > { %2070 = vmatpush1.bf16.msra.mxu1 %v2069_v13  ;;  %2118 = vmatpush1.bf16.msra.mxu0 %v2117_v14  ;;  %v692_v13 = vld [vmem:[%s3224_s1 + $0x1f8] sm:$0xff]  ;;  %v723_v14 = vld [vmem:[%s3224_s1 + $0x2f0] sm:$0xff] }
  0x84   : > { %2071 = vmatprep.subr.bf16.mxu1 %v2254_v3  ;;  %2119 = vmatprep.subr.bf16.mxu0 %v2254_v3 }
  0x85   : > { %955 = vmatmul.mubr.f32.gmra.mrb[18].mxu1 %v539_v19  ;;  %835 = vmatmul.mubr.f32.gmra.mrb[18].mxu0 %v395_v20  ;;  %v438_v19 = vld [vmem:[%s2354_s20 + $0x308] sm:$0xff]  ;;  %v2090_v20 = vpack.c.bf16 %v692_v13, %v691_v12  ;;  %v380_v12 = vld [vmem:[%s2354_s20 + $0x138] sm:$0xff] }
  0x86   : > { %959 = vmatprep.mubr.f32.mxu1 %v546_v21  ;;  %839 = vmatprep.mubr.f32.mxu0 %v402_v22  ;;  %v2138_v21 = vpack.c.bf16 %v724_v15, %v723_v14  ;;  %v581_v22 = vld [vmem:[%s2354_s20 + $0x780] sm:$0xff]  ;;  %v382_v13 = vld [vmem:[%s2354_s20 + $0x148] sm:$0xff]  ;;  %v379_v14 = vld [vmem:[%s2354_s20 + $0x130] sm:$0xff] }
  0x87   : > { %2073 = vmatpush1.bf16.msra.mxu1 %v2072_v23  ;;  %2121 = vmatpush1.bf16.msra.mxu0 %v2120_v24  ;;  %v437_v23 = vld [vmem:[%s2354_s20 + $0x300] sm:$0xff]  ;;  %v588_v24 = vld [vmem:[%s2354_s20 + $0x7b8] sm:$0xff] }
  0x88   : > { %2074 = vmatprep.subr.bf16.mxu1 %v2254_v3  ;;  %2122 = vmatprep.subr.bf16.mxu0 %v2254_v3  ;;  %v381_v15 = vld [vmem:[%s2354_s20 + $0x140] sm:$0xff] }
  0x89   : > { %960 = vmatmul.mubr.f32.gmra.mrb[20].mxu1 %v545_v29  ;;  %840 = vmatmul.mubr.f32.gmra.mrb[20].mxu0 %v401_v30  ;;  %v593_v29 = vld [vmem:[%s2354_s20 + $0x7e0] sm:$0xff] }
  0x8a   : > { %964 = vmatprep.mubr.f32.mxu1 %v552_v31  ;;  %844 = vmatprep.mubr.f32.mxu0 %v408_v32  ;;  %v449_v30 = vld [vmem:[%s2354_s20 + $0x360] sm:$0xff]  ;;  %v600_v31 = vld [vmem:[%s2354_s20 + $0x818] sm:$0xff] }
  0x8b   : > { %2076 = vmatpush1.bf16.msra.mxu1 %v2075_v33  ;;  %2124 = vmatpush1.bf16.msra.mxu0 %v2123_v34  ;;  %v456_v32 = vld [vmem:[%s2354_s20 + $0x398] sm:$0xff]  ;;  %v599_v33 = vld [vmem:[%s2354_s20 + $0x810] sm:$0xff] }
  0x8c   : > { %2077 = vmatprep.subr.bf16.mxu1 %v2254_v3  ;;  %2125 = vmatprep.subr.bf16.mxu0 %v2254_v3  ;;  %v455_v34 = vld [vmem:[%s2354_s20 + $0x390] sm:$0xff] }
  0x8d   : > { %965 = vmatmul.mubr.f32.gmra.mrb[22].mxu1 %v551_v39  ;;  %845 = vmatmul.mubr.f32.gmra.mrb[22].mxu0 %v407_v40  ;;  %v612_v39 = vld [vmem:[%s2354_s20 + $0x878] sm:$0xff] }
  0x8e   : > { %969 = vmatprep.mubr.f32.mxu1 %v558_v41  ;;  %849 = vmatprep.mubr.f32.mxu0 %v414_v42  ;;  %v468_v40 = vld [vmem:[%s2354_s20 + $0x3f8] sm:$0xff]  ;;  %v611_v41 = vld [vmem:[%s2354_s20 + $0x870] sm:$0xff] }
  0x8f   : > { %2079 = vmatpush1.bf16.msra.mxu1 %v2078_v43  ;;  %2127 = vmatpush1.bf16.msra.mxu0 %v2126_v44  ;;  %v467_v42 = vld [vmem:[%s2354_s20 + $0x3f0] sm:$0xff]  ;;  %v618_v43 = vld [vmem:[%s2354_s20 + $0x8a8] sm:$0xff] }
  0x90   : > { %2080 = vmatprep.subr.bf16.mxu1 %v2254_v3  ;;  %2128 = vmatprep.subr.bf16.mxu0 %v2254_v3  ;;  %v474_v44 = vld [vmem:[%s2354_s20 + $0x428] sm:$0xff] }
  0x91   : > { %970 = vmatmul.mubr.f32.gmra.mrb[24].mxu1 %v557_v49  ;;  %850 = vmatmul.mubr.f32.gmra.mrb[24].mxu0 %v413_v50  ;;  %v623_v49 = vld [vmem:[%s2354_s20 + $0x8d0] sm:$0xff] }
  0x92   : > { %974 = vmatprep.mubr.f32.mxu1 %v564_v51  ;;  %854 = vmatprep.mubr.f32.mxu0 %v420_v52  ;;  %v479_v50 = vld [vmem:[%s2354_s20 + $0x450] sm:$0xff]  ;;  %v344_v51 = vld [vmem:[%s2354_s20 + $0x18] sm:$0xff]  ;;  %v346_v52 = vld [vmem:[%s2354_s20 + $0x28] sm:$0xff] }
  0x93   : > { %2082 = vmatpush1.bf16.msra.mxu1 %v2081_v53  ;;  %2130 = vmatpush1.bf16.msra.mxu0 %v2129_v54  ;;  %v343_v53 = vld [vmem:[%s2354_s20 + $0x10] sm:$0xff]  ;;  %v345_v54 = vld [vmem:[%s2354_s20 + $0x20] sm:$0xff] }
  0x94   : > { %2083 = vmatprep.subr.bf16.mxu1 %v2254_v3  ;;  %2131 = vmatprep.subr.bf16.mxu0 %v2254_v3 }
  0x95   : > { %975 = vmatmul.mubr.f32.gmra.mrb[26].mxu1 %v563_v59  ;;  %855 = vmatmul.mubr.f32.gmra.mrb[26].mxu0 %v419_v60  ;;  %v356_v59 = vld [vmem:[%s2354_s20 + $0x78] sm:$0xff]  ;;  %v358_v60 = vld [vmem:[%s2354_s20 + $0x88] sm:$0xff] }
  0x96   : > { %979 = vmatprep.mubr.f32.mxu1 %v570_v61  ;;  %859 = vmatprep.mubr.f32.mxu0 %v426_v62  ;;  %v355_v61 = vld [vmem:[%s2354_s20 + $0x70] sm:$0xff]  ;;  %v357_v62 = vld [vmem:[%s2354_s20 + $0x80] sm:$0xff] }
  0x97   : > { %2085 = vmatpush1.bf16.msra.mxu1 %v2084_v63  ;;  %2133 = vmatpush1.bf16.msra.mxu0 %v2132_v0  ;;  %v362_v63 = vld [vmem:[%s2354_s20 + $0xa8] sm:$0xff]  ;;  %v364_v0 = vld [vmem:[%s2354_s20 + $0xb8] sm:$0xff] }
  0x98   : > { %2086 = vmatprep.subr.bf16.mxu1 %v2254_v3  ;;  %2134 = vmatprep.subr.bf16.mxu0 %v2254_v3 }
  0x99   : > { %980 = vmatmul.mubr.f32.gmra.mrb[28].mxu1 %v569_v6  ;;  %860 = vmatmul.mubr.f32.gmra.mrb[28].mxu0 %v425_v7  ;;  %v367_v6 = vld [vmem:[%s2354_s20 + $0xd0] sm:$0xff]  ;;  %v369_v7 = vld [vmem:[%s2354_s20 + $0xe0] sm:$0xff] }
  0x9a   : > { %984 = vmatprep.mubr.f32.mxu1 %v576_v8  ;;  %864 = vmatprep.mubr.f32.mxu0 %v432_v9  ;;  %v374_v8 = vld [vmem:[%s2354_s20 + $0x108] sm:$0xff]  ;;  %v376_v9 = vld [vmem:[%s2354_s20 + $0x118] sm:$0xff] }
  0x9b   : > { %2088 = vmatpush1.bf16.msra.mxu1 %v2087_v10  ;;  %2136 = vmatpush1.bf16.msra.mxu0 %v2135_v11  ;;  %v373_v10 = vld [vmem:[%s2354_s20 + $0x100] sm:$0xff]  ;;  %v375_v11 = vld [vmem:[%s2354_s20 + $0x110] sm:$0xff] }
  0x9c   : > { %2089 = vmatprep.subr.bf16.mxu1 %v2254_v3  ;;  %2137 = vmatprep.subr.bf16.mxu0 %v2254_v3  ;;  %v587_v3 = vld [vmem:[%s2354_s20 + $0x7b0] sm:$0xff] }
  0x9d   : > { %985 = vmatmul.mubr.f32.gmra.mrb[30].mxu1 %v575_v16  ;;  %865 = vmatmul.mubr.f32.gmra.mrb[30].mxu0 %v431_v17  ;;  %v386_v16 = vld [vmem:[%s2354_s20 + $0x168] sm:$0xff]  ;;  %v388_v17 = vld [vmem:[%s2354_s20 + $0x178] sm:$0xff] }
  0x9e   : > { %989 = vmatprep.mubr.f32.mxu1 %v582_v18  ;;  %869 = vmatprep.mubr.f32.mxu0 %v438_v19  ;;  %v385_v18 = vld [vmem:[%s2354_s20 + $0x160] sm:$0xff]  ;;  %v387_v19 = vld [vmem:[%s2354_s20 + $0x170] sm:$0xff] }
  0x9f   : > { %2091 = vmatpush1.bf16.msra.mxu1 %v2090_v20  ;;  %2139 = vmatpush1.bf16.msra.mxu0 %v2138_v21  ;;  %v392_v20 = vld [vmem:[%s2354_s20 + $0x198] sm:$0xff]  ;;  %v394_v21 = vld [vmem:[%s2354_s20 + $0x1a8] sm:$0xff] }
  0xa1   : > { %990 = vmatmul.mubr.f32.gmra.mrb[32].mxu1 %v581_v22  ;;  %870 = vmatmul.mubr.f32.gmra.mrb[32].mxu0 %v437_v23  ;;  %v391_v22 = vld [vmem:[%s2354_s20 + $0x190] sm:$0xff]  ;;  %v393_v23 = vld [vmem:[%s2354_s20 + $0x1a0] sm:$0xff] }
  0xa2   : > { %994 = vmatprep.mubr.f32.mxu1 %v588_v24  ;;  %874 = vmatprep.mubr.f32.mxu0 %v444_v25  ;;  %v398_v24 = vld [vmem:[%s2354_s20 + $0x1c8] sm:$0xff]  ;;  %v400_v25 = vld [vmem:[%s2354_s20 + $0x1d8] sm:$0xff] }
  0xa5   : > { %995 = vmatmul.mubr.f32.gmra.mrb[34].mxu1 %v587_v3  ;;  %875 = vmatmul.mubr.f32.gmra.mrb[34].mxu0 %v443_v26  ;;  %v397_v3 = vld [vmem:[%s2354_s20 + $0x1c0] sm:$0xff]  ;;  %v399_v26 = vld [vmem:[%s2354_s20 + $0x1d0] sm:$0xff] }
  0xa6   : > { %999 = vmatprep.mubr.f32.mxu1 %v594_v27  ;;  %879 = vmatprep.mubr.f32.mxu0 %v450_v28  ;;  %v404_v27 = vld [vmem:[%s2354_s20 + $0x1f8] sm:$0xff]  ;;  %v406_v28 = vld [vmem:[%s2354_s20 + $0x208] sm:$0xff] }
  0xa9   : > { %1000 = vmatmul.mubr.f32.gmra.mrb[36].mxu1 %v593_v29  ;;  %880 = vmatmul.mubr.f32.gmra.mrb[36].mxu0 %v449_v30  ;;  %v403_v29 = vld [vmem:[%s2354_s20 + $0x1f0] sm:$0xff]  ;;  %v405_v30 = vld [vmem:[%s2354_s20 + $0x200] sm:$0xff] }
  0xaa   : > { %1004 = vmatprep.mubr.f32.mxu1 %v600_v31  ;;  %884 = vmatprep.mubr.f32.mxu0 %v456_v32  ;;  %v410_v31 = vld [vmem:[%s2354_s20 + $0x228] sm:$0xff]  ;;  %v412_v32 = vld [vmem:[%s2354_s20 + $0x238] sm:$0xff] }
  0xad   : > { %1005 = vmatmul.mubr.f32.gmra.mrb[38].mxu1 %v599_v33  ;;  %885 = vmatmul.mubr.f32.gmra.mrb[38].mxu0 %v455_v34  ;;  %v409_v33 = vld [vmem:[%s2354_s20 + $0x220] sm:$0xff]  ;;  %v411_v34 = vld [vmem:[%s2354_s20 + $0x230] sm:$0xff] }
  0xae   : > { %1009 = vmatprep.mubr.f32.mxu1 %v606_v35  ;;  %889 = vmatprep.mubr.f32.mxu0 %v462_v36  ;;  %v416_v35 = vld [vmem:[%s2354_s20 + $0x258] sm:$0xff]  ;;  %v418_v36 = vld [vmem:[%s2354_s20 + $0x268] sm:$0xff] }
  0xb1   : > { %1010 = vmatmul.mubr.f32.gmra.mrb[40].mxu1 %v605_v37  ;;  %890 = vmatmul.mubr.f32.gmra.mrb[40].mxu0 %v461_v38  ;;  %v415_v37 = vld [vmem:[%s2354_s20 + $0x250] sm:$0xff]  ;;  %v417_v38 = vld [vmem:[%s2354_s20 + $0x260] sm:$0xff] }
  0xb2   : > { %1014 = vmatprep.mubr.f32.mxu1 %v612_v39  ;;  %894 = vmatprep.mubr.f32.mxu0 %v468_v40  ;;  %v422_v39 = vld [vmem:[%s2354_s20 + $0x288] sm:$0xff]  ;;  %v424_v40 = vld [vmem:[%s2354_s20 + $0x298] sm:$0xff] }
  0xb5   : > { %1015 = vmatmul.mubr.f32.gmra.mrb[42].mxu1 %v611_v41  ;;  %895 = vmatmul.mubr.f32.gmra.mrb[42].mxu0 %v467_v42  ;;  %v421_v41 = vld [vmem:[%s2354_s20 + $0x280] sm:$0xff]  ;;  %v423_v42 = vld [vmem:[%s2354_s20 + $0x290] sm:$0xff] }
  0xb6   : > { %1019 = vmatprep.mubr.f32.mxu1 %v618_v43  ;;  %899 = vmatprep.mubr.f32.mxu0 %v474_v44  ;;  %v428_v43 = vld [vmem:[%s2354_s20 + $0x2b8] sm:$0xff]  ;;  %v430_v44 = vld [vmem:[%s2354_s20 + $0x2c8] sm:$0xff] }
  0xb9   : > { %1020 = vmatmul.mubr.f32.gmra.mrb[44].mxu1 %v617_v45  ;;  %900 = vmatmul.mubr.f32.gmra.mrb[44].mxu0 %v473_v46  ;;  %v427_v45 = vld [vmem:[%s2354_s20 + $0x2b0] sm:$0xff]  ;;  %v429_v46 = vld [vmem:[%s2354_s20 + $0x2c0] sm:$0xff] }
  0xba   : > { %1024 = vmatprep.mubr.f32.mxu1 %v624_v47  ;;  %904 = vmatprep.mubr.f32.mxu0 %v480_v48  ;;  %v434_v47 = vld [vmem:[%s2354_s20 + $0x2e8] sm:$0xff]  ;;  %v436_v48 = vld [vmem:[%s2354_s20 + $0x2f8] sm:$0xff] }
  0xbd   : > { %1025 = vmatmul.mubr.f32.gmra.mrb[46].mxu1 %v623_v49  ;;  %905 = vmatmul.mubr.f32.gmra.mrb[46].mxu0 %v479_v50  ;;  %v433_v49 = vld [vmem:[%s2354_s20 + $0x2e0] sm:$0xff]  ;;  %v435_v50 = vld [vmem:[%s2354_s20 + $0x2f0] sm:$0xff] }
  0xbe   : > { %1094 = vmatprep.mubr.f32.mxu1 %v344_v51  ;;  %1399 = vmatprep.mubr.f32.mxu0 %v346_v52  ;;  %v440_v51 = vld [vmem:[%s2354_s20 + $0x318] sm:$0xff]  ;;  %v442_v52 = vld [vmem:[%s2354_s20 + $0x328] sm:$0xff] }
  0xc1   : > { %1095 = vmatmul.mubr.f32.vlgmr.msra.gmra.mrb[48].mxu1 %v343_v53  ;;  %1400 = vmatmul.mubr.f32.vlgmr.msra.gmra.mrb[48].mxu0 %v345_v54  ;;  %v439_v53 = vld [vmem:[%s2354_s20 + $0x310] sm:$0xff]  ;;  %v441_v54 = vld [vmem:[%s2354_s20 + $0x320] sm:$0xff] }
  0xc2   : > { %1099 = vmatprep.mubr.f32.mxu1 %v350_v55  ;;  %1404 = vmatprep.mubr.f32.mxu0 %v352_v56  ;;  %v446_v55 = vld [vmem:[%s2354_s20 + $0x348] sm:$0xff]  ;;  %v448_v56 = vld [vmem:[%s2354_s20 + $0x358] sm:$0xff] }
  0xc5   : > { %1100 = vmatmul.mubr.f32.gmra.mrb[50].mxu1 %v349_v57  ;;  %1405 = vmatmul.mubr.f32.gmra.mrb[50].mxu0 %v351_v58  ;;  %v445_v57 = vld [vmem:[%s2354_s20 + $0x340] sm:$0xff]  ;;  %v447_v58 = vld [vmem:[%s2354_s20 + $0x350] sm:$0xff] }
  0xc6   : > { %1104 = vmatprep.mubr.f32.mxu1 %v356_v59  ;;  %1409 = vmatprep.mubr.f32.mxu0 %v358_v60  ;;  %v452_v59 = vld [vmem:[%s2354_s20 + $0x378] sm:$0xff]  ;;  %v454_v60 = vld [vmem:[%s2354_s20 + $0x388] sm:$0xff] }
  0xc9   : > { %1105 = vmatmul.mubr.f32.gmra.mrb[52].mxu1 %v355_v61  ;;  %1410 = vmatmul.mubr.f32.gmra.mrb[52].mxu0 %v357_v62  ;;  %v451_v61 = vld [vmem:[%s2354_s20 + $0x370] sm:$0xff]  ;;  %v453_v62 = vld [vmem:[%s2354_s20 + $0x380] sm:$0xff] }
  0xca   : > { %1109 = vmatprep.mubr.f32.mxu1 %v362_v63  ;;  %1414 = vmatprep.mubr.f32.mxu0 %v364_v0  ;;  %v458_v63 = vld [vmem:[%s2354_s20 + $0x3a8] sm:$0xff]  ;;  %v460_v0 = vld [vmem:[%s2354_s20 + $0x3b8] sm:$0xff] }
  0xcd   : > { %1110 = vmatmul.mubr.f32.gmra.mrb[54].mxu1 %v361_v1  ;;  %1415 = vmatmul.mubr.f32.gmra.mrb[54].mxu0 %v363_v2  ;;  %v457_v1 = vld [vmem:[%s2354_s20 + $0x3a0] sm:$0xff]  ;;  %v459_v2 = vld [vmem:[%s2354_s20 + $0x3b0] sm:$0xff] }
  0xce   : > { %1114 = vmatprep.mubr.f32.mxu1 %v368_v4  ;;  %1419 = vmatprep.mubr.f32.mxu0 %v370_v5  ;;  %v464_v4 = vld [vmem:[%s2354_s20 + $0x3d8] sm:$0xff]  ;;  %v466_v5 = vld [vmem:[%s2354_s20 + $0x3e8] sm:$0xff] }
  0xd1   : > { %1115 = vmatmul.mubr.f32.gmra.mrb[56].mxu1 %v367_v6  ;;  %1420 = vmatmul.mubr.f32.gmra.mrb[56].mxu0 %v369_v7  ;;  %v463_v6 = vld [vmem:[%s2354_s20 + $0x3d0] sm:$0xff]  ;;  %v465_v7 = vld [vmem:[%s2354_s20 + $0x3e0] sm:$0xff] }
  0xd2   : > { %1119 = vmatprep.mubr.f32.mxu1 %v374_v8  ;;  %1424 = vmatprep.mubr.f32.mxu0 %v376_v9  ;;  %v470_v8 = vld [vmem:[%s2354_s20 + $0x408] sm:$0xff]  ;;  %v472_v9 = vld [vmem:[%s2354_s20 + $0x418] sm:$0xff] }
  0xd5   : > { %1120 = vmatmul.mubr.f32.gmra.mrb[58].mxu1 %v373_v10  ;;  %1425 = vmatmul.mubr.f32.gmra.mrb[58].mxu0 %v375_v11  ;;  %v469_v10 = vld [vmem:[%s2354_s20 + $0x400] sm:$0xff]  ;;  %v471_v11 = vld [vmem:[%s2354_s20 + $0x410] sm:$0xff] }
  0xd6   : > { %1124 = vmatprep.mubr.f32.mxu1 %v380_v12  ;;  %1429 = vmatprep.mubr.f32.mxu0 %v382_v13  ;;  %v476_v12 = vld [vmem:[%s2354_s20 + $0x438] sm:$0xff]  ;;  %v478_v13 = vld [vmem:[%s2354_s20 + $0x448] sm:$0xff] }
  0xd9   : > { %1125 = vmatmul.mubr.f32.gmra.mrb[60].mxu1 %v379_v14  ;;  %1430 = vmatmul.mubr.f32.gmra.mrb[60].mxu0 %v381_v15  ;;  %v475_v14 = vld [vmem:[%s2354_s20 + $0x430] sm:$0xff]  ;;  %v477_v15 = vld [vmem:[%s2354_s20 + $0x440] sm:$0xff] }
  0xda   : > { %1129 = vmatprep.mubr.f32.mxu1 %v386_v16  ;;  %1434 = vmatprep.mubr.f32.mxu0 %v388_v17  ;;  %v482_v16 = vld [vmem:[%s2354_s20 + $0x468] sm:$0xff]  ;;  %v484_v17 = vld [vmem:[%s2354_s20 + $0x478] sm:$0xff] }
  0xdd   : > { %1130 = vmatmul.mubr.f32.gmra.mrb[62].mxu1 %v385_v18  ;;  %1435 = vmatmul.mubr.f32.gmra.mrb[62].mxu0 %v387_v19  ;;  %v481_v18 = vld [vmem:[%s2354_s20 + $0x460] sm:$0xff]  ;;  %v483_v19 = vld [vmem:[%s2354_s20 + $0x470] sm:$0xff] }
  0xde   : > { %1134 = vmatprep.mubr.f32.mxu1 %v392_v20  ;;  %1439 = vmatprep.mubr.f32.mxu0 %v394_v21  ;;  %v488_v20 = vld [vmem:[%s2354_s20 + $0x498] sm:$0xff]  ;;  %v490_v21 = vld [vmem:[%s2354_s20 + $0x4a8] sm:$0xff] }
  0xe1   : > { %1135 = vmatmul.mubr.f32.gmra.mrb[64].mxu1 %v391_v22  ;;  %1440 = vmatmul.mubr.f32.gmra.mrb[64].mxu0 %v393_v23  ;;  %v487_v22 = vld [vmem:[%s2354_s20 + $0x490] sm:$0xff]  ;;  %v489_v23 = vld [vmem:[%s2354_s20 + $0x4a0] sm:$0xff] }
  0xe2   : > { %1139 = vmatprep.mubr.f32.mxu1 %v398_v24  ;;  %1444 = vmatprep.mubr.f32.mxu0 %v400_v25  ;;  %v494_v24 = vld [vmem:[%s2354_s20 + $0x4c8] sm:$0xff]  ;;  %v496_v25 = vld [vmem:[%s2354_s20 + $0x4d8] sm:$0xff] }
  0xe5   : > { %1140 = vmatmul.mubr.f32.gmra.mrb[66].mxu1 %v397_v3  ;;  %1445 = vmatmul.mubr.f32.gmra.mrb[66].mxu0 %v399_v26  ;;  %v493_v3 = vld [vmem:[%s2354_s20 + $0x4c0] sm:$0xff]  ;;  %v495_v26 = vld [vmem:[%s2354_s20 + $0x4d0] sm:$0xff] }
  0xe6   : > { %1144 = vmatprep.mubr.f32.mxu1 %v404_v27  ;;  %1449 = vmatprep.mubr.f32.mxu0 %v406_v28  ;;  %v500_v27 = vld [vmem:[%s2354_s20 + $0x4f8] sm:$0xff]  ;;  %v502_v28 = vld [vmem:[%s2354_s20 + $0x508] sm:$0xff] }
  0xe9   : > { %1145 = vmatmul.mubr.f32.gmra.mrb[68].mxu1 %v403_v29  ;;  %1450 = vmatmul.mubr.f32.gmra.mrb[68].mxu0 %v405_v30  ;;  %v499_v29 = vld [vmem:[%s2354_s20 + $0x4f0] sm:$0xff]  ;;  %v501_v30 = vld [vmem:[%s2354_s20 + $0x500] sm:$0xff] }
  0xea   : > { %1149 = vmatprep.mubr.f32.mxu1 %v410_v31  ;;  %1454 = vmatprep.mubr.f32.mxu0 %v412_v32  ;;  %v506_v31 = vld [vmem:[%s2354_s20 + $0x528] sm:$0xff]  ;;  %v508_v32 = vld [vmem:[%s2354_s20 + $0x538] sm:$0xff] }
  0xed   : > { %1150 = vmatmul.mubr.f32.gmra.mrb[70].mxu1 %v409_v33  ;;  %1455 = vmatmul.mubr.f32.gmra.mrb[70].mxu0 %v411_v34  ;;  %v505_v33 = vld [vmem:[%s2354_s20 + $0x520] sm:$0xff]  ;;  %v507_v34 = vld [vmem:[%s2354_s20 + $0x530] sm:$0xff] }
  0xee   : > { %1154 = vmatprep.mubr.f32.mxu1 %v416_v35  ;;  %1459 = vmatprep.mubr.f32.mxu0 %v418_v36  ;;  %v512_v35 = vld [vmem:[%s2354_s20 + $0x558] sm:$0xff]  ;;  %v514_v36 = vld [vmem:[%s2354_s20 + $0x568] sm:$0xff] }
  0xf1   : > { %1155 = vmatmul.mubr.f32.gmra.mrb[72].mxu1 %v415_v37  ;;  %1460 = vmatmul.mubr.f32.gmra.mrb[72].mxu0 %v417_v38  ;;  %v511_v37 = vld [vmem:[%s2354_s20 + $0x550] sm:$0xff]  ;;  %v513_v38 = vld [vmem:[%s2354_s20 + $0x560] sm:$0xff] }
  0xf2   : > { %1159 = vmatprep.mubr.f32.mxu1 %v422_v39  ;;  %1464 = vmatprep.mubr.f32.mxu0 %v424_v40  ;;  %v518_v39 = vld [vmem:[%s2354_s20 + $0x588] sm:$0xff]  ;;  %v520_v40 = vld [vmem:[%s2354_s20 + $0x598] sm:$0xff] }
  0xf5   : > { %1160 = vmatmul.mubr.f32.gmra.mrb[74].mxu1 %v421_v41  ;;  %1465 = vmatmul.mubr.f32.gmra.mrb[74].mxu0 %v423_v42  ;;  %v517_v41 = vld [vmem:[%s2354_s20 + $0x580] sm:$0xff]  ;;  %v519_v42 = vld [vmem:[%s2354_s20 + $0x590] sm:$0xff] }
  0xf6   : > { %1164 = vmatprep.mubr.f32.mxu1 %v428_v43  ;;  %1469 = vmatprep.mubr.f32.mxu0 %v430_v44  ;;  %v524_v43 = vld [vmem:[%s2354_s20 + $0x5b8] sm:$0xff]  ;;  %v526_v44 = vld [vmem:[%s2354_s20 + $0x5c8] sm:$0xff] }
  0xf9   : > { %1165 = vmatmul.mubr.f32.gmra.mrb[76].mxu1 %v427_v45  ;;  %1470 = vmatmul.mubr.f32.gmra.mrb[76].mxu0 %v429_v46 }
  0xfa   : > { %1169 = vmatprep.mubr.f32.mxu1 %v434_v47  ;;  %1474 = vmatprep.mubr.f32.mxu0 %v436_v48 }
  0xfd   : > { %1170 = vmatmul.mubr.f32.gmra.mrb[78].mxu1 %v433_v49  ;;  %1475 = vmatmul.mubr.f32.gmra.mrb[78].mxu0 %v435_v50  ;;  %v523_v49 = vld [vmem:[%s2354_s20 + $0x5b0] sm:$0xff]  ;;  %v525_v50 = vld [vmem:[%s2354_s20 + $0x5c0] sm:$0xff] }
  0xfe   : > { %1174 = vmatprep.mubr.f32.mxu1 %v440_v51  ;;  %1479 = vmatprep.mubr.f32.mxu0 %v442_v52  ;;  %v530_v51 = vld [vmem:[%s2354_s20 + $0x5e8] sm:$0xff]  ;;  %v532_v52 = vld [vmem:[%s2354_s20 + $0x5f8] sm:$0xff] }
 0x101   : > { %1175 = vmatmul.mubr.f32.gmra.mrb[80].mxu1 %v439_v53  ;;  %1480 = vmatmul.mubr.f32.gmra.mrb[80].mxu0 %v441_v54 }
 0x102   : > { %1179 = vmatprep.mubr.f32.mxu1 %v446_v55  ;;  %1484 = vmatprep.mubr.f32.mxu0 %v448_v56 }
 0x105   : > { %1180 = vmatmul.mubr.f32.gmra.mrb[82].mxu1 %v445_v57  ;;  %1485 = vmatmul.mubr.f32.gmra.mrb[82].mxu0 %v447_v58  ;;  %v529_v57 = vld [vmem:[%s2354_s20 + $0x5e0] sm:$0xff]  ;;  %v531_v58 = vld [vmem:[%s2354_s20 + $0x5f0] sm:$0xff] }
 0x106   : > { %1184 = vmatprep.mubr.f32.mxu1 %v452_v59  ;;  %1489 = vmatprep.mubr.f32.mxu0 %v454_v60  ;;  %v536_v59 = vld [vmem:[%s2354_s20 + $0x618] sm:$0xff]  ;;  %v538_v60 = vld [vmem:[%s2354_s20 + $0x628] sm:$0xff] }
 0x109   : > { %1185 = vmatmul.mubr.f32.gmra.mrb[84].mxu1 %v451_v61  ;;  %1490 = vmatmul.mubr.f32.gmra.mrb[84].mxu0 %v453_v62 }
 0x10a   : > { %1189 = vmatprep.mubr.f32.mxu1 %v458_v63  ;;  %1494 = vmatprep.mubr.f32.mxu0 %v460_v0 }
 0x10d   : > { %1190 = vmatmul.mubr.f32.gmra.mrb[86].mxu1 %v457_v1  ;;  %1495 = vmatmul.mubr.f32.gmra.mrb[86].mxu0 %v459_v2  ;;  %v535_v1 = vld [vmem:[%s2354_s20 + $0x610] sm:$0xff]  ;;  %v537_v2 = vld [vmem:[%s2354_s20 + $0x620] sm:$0xff] }
 0x10e   : > { %1194 = vmatprep.mubr.f32.mxu1 %v464_v4  ;;  %1499 = vmatprep.mubr.f32.mxu0 %v466_v5  ;;  %v542_v4 = vld [vmem:[%s2354_s20 + $0x648] sm:$0xff]  ;;  %v544_v5 = vld [vmem:[%s2354_s20 + $0x658] sm:$0xff] }
 0x111   : > { %1195 = vmatmul.mubr.f32.gmra.mrb[88].mxu1 %v463_v6  ;;  %1500 = vmatmul.mubr.f32.gmra.mrb[88].mxu0 %v465_v7 }
 0x112   : > { %1199 = vmatprep.mubr.f32.mxu1 %v470_v8  ;;  %1504 = vmatprep.mubr.f32.mxu0 %v472_v9 }
 0x115   : > { %1200 = vmatmul.mubr.f32.gmra.mrb[90].mxu1 %v469_v10  ;;  %1505 = vmatmul.mubr.f32.gmra.mrb[90].mxu0 %v471_v11  ;;  %v541_v10 = vld [vmem:[%s2354_s20 + $0x640] sm:$0xff]  ;;  %v543_v11 = vld [vmem:[%s2354_s20 + $0x650] sm:$0xff] }
 0x116   : > { %1204 = vmatprep.mubr.f32.mxu1 %v476_v12  ;;  %1509 = vmatprep.mubr.f32.mxu0 %v478_v13  ;;  %v548_v12 = vld [vmem:[%s2354_s20 + $0x678] sm:$0xff]  ;;  %v550_v13 = vld [vmem:[%s2354_s20 + $0x688] sm:$0xff] }
 0x119   : > { %1205 = vmatmul.mubr.f32.gmra.mrb[92].mxu1 %v475_v14  ;;  %1510 = vmatmul.mubr.f32.gmra.mrb[92].mxu0 %v477_v15 }
 0x11a   : > { %1209 = vmatprep.mubr.f32.mxu1 %v482_v16  ;;  %1514 = vmatprep.mubr.f32.mxu0 %v484_v17 }
 0x11d   : > { %1210 = vmatmul.mubr.f32.gmra.mrb[94].mxu1 %v481_v18  ;;  %1515 = vmatmul.mubr.f32.gmra.mrb[94].mxu0 %v483_v19  ;;  %v547_v18 = vld [vmem:[%s2354_s20 + $0x670] sm:$0xff]  ;;  %v549_v19 = vld [vmem:[%s2354_s20 + $0x680] sm:$0xff] }
 0x11e   : > { %1214 = vmatprep.mubr.f32.mxu1 %v488_v20  ;;  %1519 = vmatprep.mubr.f32.mxu0 %v490_v21  ;;  %v554_v20 = vld [vmem:[%s2354_s20 + $0x6a8] sm:$0xff]  ;;  %v556_v21 = vld [vmem:[%s2354_s20 + $0x6b8] sm:$0xff] }
 0x121   : > { %1215 = vmatmul.mubr.f32.gmra.mrb[96].mxu1 %v487_v22  ;;  %1520 = vmatmul.mubr.f32.gmra.mrb[96].mxu0 %v489_v23 }
 0x122   : > { %1219 = vmatprep.mubr.f32.mxu1 %v494_v24  ;;  %1524 = vmatprep.mubr.f32.mxu0 %v496_v25 }
 0x125   : > { %1220 = vmatmul.mubr.f32.gmra.mrb[98].mxu1 %v493_v3  ;;  %1525 = vmatmul.mubr.f32.gmra.mrb[98].mxu0 %v495_v26  ;;  %v553_v3 = vld [vmem:[%s2354_s20 + $0x6a0] sm:$0xff]  ;;  %v555_v26 = vld [vmem:[%s2354_s20 + $0x6b0] sm:$0xff] }
 0x126   : > { %1224 = vmatprep.mubr.f32.mxu1 %v500_v27  ;;  %1529 = vmatprep.mubr.f32.mxu0 %v502_v28  ;;  %v560_v27 = vld [vmem:[%s2354_s20 + $0x6d8] sm:$0xff]  ;;  %v562_v28 = vld [vmem:[%s2354_s20 + $0x6e8] sm:$0xff] }
 0x129   : > { %1225 = vmatmul.mubr.f32.gmra.mrb[100].mxu1 %v499_v29  ;;  %1530 = vmatmul.mubr.f32.gmra.mrb[100].mxu0 %v501_v30 }
 0x12a   : > { %1229 = vmatprep.mubr.f32.mxu1 %v506_v31  ;;  %1534 = vmatprep.mubr.f32.mxu0 %v508_v32 }
 0x12d   : > { %1230 = vmatmul.mubr.f32.gmra.mrb[102].mxu1 %v505_v33  ;;  %1535 = vmatmul.mubr.f32.gmra.mrb[102].mxu0 %v507_v34  ;;  %v559_v33 = vld [vmem:[%s2354_s20 + $0x6d0] sm:$0xff]  ;;  %v561_v34 = vld [vmem:[%s2354_s20 + $0x6e0] sm:$0xff] }
 0x12e   : > { %1234 = vmatprep.mubr.f32.mxu1 %v512_v35  ;;  %1539 = vmatprep.mubr.f32.mxu0 %v514_v36  ;;  %v566_v35 = vld [vmem:[%s2354_s20 + $0x708] sm:$0xff]  ;;  %v568_v36 = vld [vmem:[%s2354_s20 + $0x718] sm:$0xff] }
 0x131   : > { %1235 = vmatmul.mubr.f32.gmra.mrb[104].mxu1 %v511_v37  ;;  %1540 = vmatmul.mubr.f32.gmra.mrb[104].mxu0 %v513_v38 }
 0x132   : > { %1239 = vmatprep.mubr.f32.mxu1 %v518_v39  ;;  %1544 = vmatprep.mubr.f32.mxu0 %v520_v40 }
 0x134   : > { %v2896_v45 = vpop.f32.mrb[0].mxu1  ;;  %v2898_v46 = vpop.f32.mrb[0].mxu0 }
 0x135   : > { %v913_v47 = vpop.f32.mrb[1].mxu1  ;;  %1240 = vmatmul.mubr.f32.gmra.mrb[106].mxu1 %v517_v41  ;;  %v793_v48 = vpop.f32.mrb[1].mxu0  ;;  %1545 = vmatmul.mubr.f32.gmra.mrb[106].mxu0 %v519_v42  ;;  %v565_v41 = vld [vmem:[%s2354_s20 + $0x700] sm:$0xff]  ;;  %v567_v42 = vld [vmem:[%s2354_s20 + $0x710] sm:$0xff] }
 0x136   : > { %1244 = vmatprep.mubr.f32.mxu1 %v524_v43  ;;  %1549 = vmatprep.mubr.f32.mxu0 %v526_v44  ;;  %v572_v43 = vld [vmem:[%s2354_s20 + $0x738] sm:$0xff]  ;;  %v574_v44 = vld [vmem:[%s2354_s20 + $0x748] sm:$0xff] }
 0x138   : > { %v2904_v53 = vpop.f32.mrb[2].mxu1  ;;  %v2906_v54 = vpop.f32.mrb[2].mxu0 }
 0x139   : > { %v918_v55 = vpop.f32.mrb[3].mxu1  ;;  %1245 = vmatmul.mubr.f32.gmra.mrb[108].mxu1 %v523_v49  ;;  %v798_v56 = vpop.f32.mrb[3].mxu0  ;;  %1550 = vmatmul.mubr.f32.gmra.mrb[108].mxu0 %v525_v50 }
 0x13a   : > { %1249 = vmatprep.mubr.f32.mxu1 %v530_v51  ;;  %1554 = vmatprep.mubr.f32.mxu0 %v532_v52  ;;  %v571_v51 = vld [vmem:[%s2354_s20 + $0x730] sm:$0xff]  ;;  %v573_v52 = vld [vmem:[%s2354_s20 + $0x740] sm:$0xff]  ;;  %v578_v55 = vld [vmem:[%s2354_s20 + $0x768] sm:$0xff] }
 0x13b   : > { %v580_v56 = vld [vmem:[%s2354_s20 + $0x778] sm:$0xff] }
 0x13c   : > { %v2912_v61 = vpop.f32.mrb[4].mxu1  ;;  %v2914_v62 = vpop.f32.mrb[4].mxu0 }
 0x13d   : > { %v923_v63 = vpop.f32.mrb[5].mxu1  ;;  %1250 = vmatmul.mubr.f32.gmra.mrb[110].mxu1 %v529_v57  ;;  %v803_v0 = vpop.f32.mrb[5].mxu0  ;;  %1555 = vmatmul.mubr.f32.gmra.mrb[110].mxu0 %v531_v58 }
 0x13e   : > { %1254 = vmatprep.mubr.f32.mxu1 %v536_v59  ;;  %1559 = vmatprep.mubr.f32.mxu0 %v538_v60  ;;  %v577_v63 = vld [vmem:[%s2354_s20 + $0x760] sm:$0xff]  ;;  %v579_v0 = vld [vmem:[%s2354_s20 + $0x770] sm:$0xff] }
 0x140   : > { %v2920_v6 = vpop.f32.mrb[6].mxu1  ;;  %v2922_v7 = vpop.f32.mrb[6].mxu0 }
 0x141   : > { %v928_v8 = vpop.f32.mrb[7].mxu1  ;;  %1255 = vmatmul.mubr.f32.gmra.mrb[112].mxu1 %v535_v1  ;;  %v808_v9 = vpop.f32.mrb[7].mxu0  ;;  %1560 = vmatmul.mubr.f32.gmra.mrb[112].mxu0 %v537_v2  ;;  %v584_v1 = vld [vmem:[%s2354_s20 + $0x798] sm:$0xff]  ;;  %v586_v2 = vld [vmem:[%s2354_s20 + $0x7a8] sm:$0xff] }
 0x142   : > { %1259 = vmatprep.mubr.f32.mxu1 %v542_v4  ;;  %1564 = vmatprep.mubr.f32.mxu0 %v544_v5 }
 0x144   : > { %v2928_v14 = vpop.f32.mrb[8].mxu1  ;;  %v2930_v15 = vpop.f32.mrb[8].mxu0 }
 0x145   : > { %v933_v16 = vpop.f32.mrb[9].mxu1  ;;  %1260 = vmatmul.mubr.f32.gmra.mrb[114].mxu1 %v541_v10  ;;  %v813_v17 = vpop.f32.mrb[9].mxu0  ;;  %1565 = vmatmul.mubr.f32.gmra.mrb[114].mxu0 %v543_v11  ;;  %v583_v10 = vld [vmem:[%s2354_s20 + $0x790] sm:$0xff]  ;;  %v585_v11 = vld [vmem:[%s2354_s20 + $0x7a0] sm:$0xff] }
 0x146   : > { %1264 = vmatprep.mubr.f32.mxu1 %v548_v12  ;;  %1569 = vmatprep.mubr.f32.mxu0 %v550_v13  ;;  %v590_v12 = vld [vmem:[%s2354_s20 + $0x7c8] sm:$0xff]  ;;  %v592_v13 = vld [vmem:[%s2354_s20 + $0x7d8] sm:$0xff] }
 0x148   : > { %v2936_v22 = vpop.f32.mrb[10].mxu1  ;;  %v2938_v23 = vpop.f32.mrb[10].mxu0 }
 0x149   : > { %v938_v24 = vpop.f32.mrb[11].mxu1  ;;  %1265 = vmatmul.mubr.f32.gmra.mrb[116].mxu1 %v547_v18  ;;  %v818_v25 = vpop.f32.mrb[11].mxu0  ;;  %1570 = vmatmul.mubr.f32.gmra.mrb[116].mxu0 %v549_v19 }
 0x14a   : > { %1269 = vmatprep.mubr.f32.mxu1 %v554_v20  ;;  %1574 = vmatprep.mubr.f32.mxu0 %v556_v21  ;;  %v589_v20 = vld [vmem:[%s2354_s20 + $0x7c0] sm:$0xff]  ;;  %v591_v21 = vld [vmem:[%s2354_s20 + $0x7d0] sm:$0xff]  ;;  %v596_v24 = vld [vmem:[%s2354_s20 + $0x7f8] sm:$0xff] }
 0x14b   : > { %v598_v25 = vld [vmem:[%s2354_s20 + $0x808] sm:$0xff] }
 0x14c   : > { %v2944_v29 = vpop.f32.mrb[12].mxu1  ;;  %v2946_v30 = vpop.f32.mrb[12].mxu0 }
 0x14d   : > { %v943_v31 = vpop.f32.mrb[13].mxu1  ;;  %1270 = vmatmul.mubr.f32.gmra.mrb[118].mxu1 %v553_v3  ;;  %v823_v32 = vpop.f32.mrb[13].mxu0  ;;  %1575 = vmatmul.mubr.f32.gmra.mrb[118].mxu0 %v555_v26 }
 0x14e   : > { %1274 = vmatprep.mubr.f32.mxu1 %v560_v27  ;;  %1579 = vmatprep.mubr.f32.mxu0 %v562_v28  ;;  %v595_v31 = vld [vmem:[%s2354_s20 + $0x7f0] sm:$0xff]  ;;  %v597_v32 = vld [vmem:[%s2354_s20 + $0x800] sm:$0xff] }
 0x150   : > { %v2952_v37 = vpop.f32.mrb[14].mxu1  ;;  %v2954_v38 = vpop.f32.mrb[14].mxu0 }
 0x151   : > { %v948_v39 = vpop.f32.mrb[15].mxu1  ;;  %1275 = vmatmul.mubr.f32.gmra.mrb[120].mxu1 %v559_v33  ;;  %v828_v40 = vpop.f32.mrb[15].mxu0  ;;  %1580 = vmatmul.mubr.f32.gmra.mrb[120].mxu0 %v561_v34  ;;  %v602_v33 = vld [vmem:[%s2354_s20 + $0x828] sm:$0xff]  ;;  %v604_v34 = vld [vmem:[%s2354_s20 + $0x838] sm:$0xff] }
 0x152   : > { %1279 = vmatprep.mubr.f32.mxu1 %v566_v35  ;;  %1584 = vmatprep.mubr.f32.mxu0 %v568_v36 }
 0x154   : > { %v2960_v47 = vpop.f32.mrb[16].mxu1  ;;  %v2962_v48 = vpop.f32.mrb[16].mxu0 }
 0x155   : > { %v953_v49 = vpop.f32.mrb[17].mxu1  ;;  %1280 = vmatmul.mubr.f32.gmra.mrb[122].mxu1 %v565_v41  ;;  %v833_v50 = vpop.f32.mrb[17].mxu0  ;;  %1585 = vmatmul.mubr.f32.gmra.mrb[122].mxu0 %v567_v42  ;;  %v601_v41 = vld [vmem:[%s2354_s20 + $0x820] sm:$0xff]  ;;  %v603_v42 = vld [vmem:[%s2354_s20 + $0x830] sm:$0xff] }
 0x156   : > { %1284 = vmatprep.mubr.f32.mxu1 %v572_v43  ;;  %1589 = vmatprep.mubr.f32.mxu0 %v574_v44  ;;  %v608_v43 = vld [vmem:[%s2354_s20 + $0x858] sm:$0xff]  ;;  %v610_v44 = vld [vmem:[%s2354_s20 + $0x868] sm:$0xff] }
 0x158   : > { %v2968_v57 = vpop.f32.mrb[18].mxu1  ;;  %v2970_v58 = vpop.f32.mrb[18].mxu0 }
 0x159   : > { %v958_v59 = vpop.f32.mrb[19].mxu1  ;;  %1285 = vmatmul.mubr.f32.gmra.mrb[124].mxu1 %v571_v51  ;;  %v838_v60 = vpop.f32.mrb[19].mxu0  ;;  %1590 = vmatmul.mubr.f32.gmra.mrb[124].mxu0 %v573_v52 }
 0x15a   : > { %1289 = vmatprep.mubr.f32.mxu1 %v578_v55  ;;  %1594 = vmatprep.mubr.f32.mxu0 %v580_v56  ;;  %v607_v55 = vld [vmem:[%s2354_s20 + $0x850] sm:$0xff]  ;;  %v609_v56 = vld [vmem:[%s2354_s20 + $0x860] sm:$0xff]  ;;  %v614_v59 = vld [vmem:[%s2354_s20 + $0x888] sm:$0xff] }
 0x15b   : > { %v616_v60 = vld [vmem:[%s2354_s20 + $0x898] sm:$0xff] }
 0x15c   : > { %v2976_v4 = vpop.f32.mrb[20].mxu1  ;;  %v2978_v5 = vpop.f32.mrb[20].mxu0 }
 0x15d   : > { %v963_v8 = vpop.f32.mrb[21].mxu1  ;;  %1290 = vmatmul.mubr.f32.gmra.mrb[126].mxu1 %v577_v63  ;;  %v843_v9 = vpop.f32.mrb[21].mxu0  ;;  %1595 = vmatmul.mubr.f32.gmra.mrb[126].mxu0 %v579_v0 }
 0x15e   : > { %1294 = vmatprep.mubr.f32.mxu1 %v584_v1  ;;  %1599 = vmatprep.mubr.f32.mxu0 %v586_v2  ;;  %v613_v8 = vld [vmem:[%s2354_s20 + $0x880] sm:$0xff]  ;;  %v615_v9 = vld [vmem:[%s2354_s20 + $0x890] sm:$0xff] }
 0x160   : > { %v2984_v16 = vpop.f32.mrb[22].mxu1  ;;  %v2986_v17 = vpop.f32.mrb[22].mxu0 }
 0x161   : > { %v968_v18 = vpop.f32.mrb[23].mxu1  ;;  %1295 = vmatmul.mubr.f32.gmra.mrb[128].mxu1 %v583_v10  ;;  %v848_v19 = vpop.f32.mrb[23].mxu0  ;;  %1600 = vmatmul.mubr.f32.gmra.mrb[128].mxu0 %v585_v11  ;;  %v620_v10 = vld [vmem:[%s2354_s20 + $0x8b8] sm:$0xff]  ;;  %v622_v11 = vld [vmem:[%s2354_s20 + $0x8c8] sm:$0xff] }
 0x162   : > { %1299 = vmatprep.mubr.f32.mxu1 %v590_v12  ;;  %1604 = vmatprep.mubr.f32.mxu0 %v592_v13 }
 0x164   : > { %v2992_v3 = vpop.f32.mrb[24].mxu1  ;;  %v2994_v26 = vpop.f32.mrb[24].mxu0 }
 0x165   : > { %v973_v27 = vpop.f32.mrb[25].mxu1  ;;  %1300 = vmatmul.mubr.f32.gmra.mrb[130].mxu1 %v589_v20  ;;  %v853_v28 = vpop.f32.mrb[25].mxu0  ;;  %1605 = vmatmul.mubr.f32.gmra.mrb[130].mxu0 %v591_v21  ;;  %v619_v20 = vld [vmem:[%s2354_s20 + $0x8b0] sm:$0xff]  ;;  %v621_v21 = vld [vmem:[%s2354_s20 + $0x8c0] sm:$0xff] }
 0x166   : > { %1304 = vmatprep.mubr.f32.mxu1 %v596_v24  ;;  %1609 = vmatprep.mubr.f32.mxu0 %v598_v25  ;;  %v626_v24 = vld [vmem:[%s2354_s20 + $0x8e8] sm:$0xff]  ;;  %v628_v25 = vld [vmem:[%s2354_s20 + $0x8f8] sm:$0xff] }
 0x168   : > { %v3000_v35 = vpop.f32.mrb[26].mxu1  ;;  %v3002_v36 = vpop.f32.mrb[26].mxu0 }
 0x169   : > { %v978_v39 = vpop.f32.mrb[27].mxu1  ;;  %1305 = vmatmul.mubr.f32.gmra.mrb[132].mxu1 %v595_v31  ;;  %v858_v40 = vpop.f32.mrb[27].mxu0  ;;  %1610 = vmatmul.mubr.f32.gmra.mrb[132].mxu0 %v597_v32 }
 0x16a   : > { %1309 = vmatprep.mubr.f32.mxu1 %v602_v33  ;;  %1614 = vmatprep.mubr.f32.mxu0 %v604_v34  ;;  %v625_v33 = vld [vmem:[%s2354_s20 + $0x8e0] sm:$0xff]  ;;  %v627_v34 = vld [vmem:[%s2354_s20 + $0x8f0] sm:$0xff]  ;;  %s1993_s20 = sld [smem:[#allocation2 + $0x1]] }
 0x16c   : > { %v3008_v49 = vpop.f32.mrb[28].mxu1  ;;  %v3010_v50 = vpop.f32.mrb[28].mxu0 }
 0x16d   : > { %v983_v51 = vpop.f32.mrb[29].mxu1  ;;  %1310 = vmatmul.mubr.f32.gmra.mrb[134].mxu1 %v601_v41  ;;  %v863_v52 = vpop.f32.mrb[29].mxu0  ;;  %1615 = vmatmul.mubr.f32.gmra.mrb[134].mxu0 %v603_v42 }
 0x16e   : > { %1314 = vmatprep.mubr.f32.mxu1 %v608_v43  ;;  %1619 = vmatprep.mubr.f32.mxu0 %v610_v44 }
 0x170   : > { %v3016_v63 = vpop.f32.mrb[30].mxu1  ;;  %v3018_v0 = vpop.f32.mrb[30].mxu0 }
 0x171   : > { %v988_v1 = vpop.f32.mrb[31].mxu1  ;;  %1315 = vmatmul.mubr.f32.gmra.mrb[136].mxu1 %v607_v55  ;;  %v868_v2 = vpop.f32.mrb[31].mxu0  ;;  %1620 = vmatmul.mubr.f32.gmra.mrb[136].mxu0 %v609_v56 }
 0x172   : > { %1319 = vmatprep.mubr.f32.mxu1 %v614_v59  ;;  %1624 = vmatprep.mubr.f32.mxu0 %v616_v60 }
 0x174   : > { %v3024_v12 = vpop.f32.mrb[32].mxu1  ;;  %v3026_v13 = vpop.f32.mrb[32].mxu0 }
 0x175   : > { %v993_v18 = vpop.f32.mrb[33].mxu1  ;;  %1320 = vmatmul.mubr.f32.gmra.mrb[138].mxu1 %v613_v8  ;;  %v873_v19 = vpop.f32.mrb[33].mxu0  ;;  %1625 = vmatmul.mubr.f32.gmra.mrb[138].mxu0 %v615_v9 }
 0x176   : > { %1324 = vmatprep.mubr.f32.mxu1 %v620_v10  ;;  %1629 = vmatprep.mubr.f32.mxu0 %v622_v11 }
 0x178   : > { %v3032_v27 = vpop.f32.mrb[34].mxu1  ;;  %v3034_v28 = vpop.f32.mrb[34].mxu0 }
 0x179   : > { %v998_v31 = vpop.f32.mrb[35].mxu1  ;;  %1325 = vmatmul.mubr.f32.gmra.mrb[140].mxu1 %v619_v20  ;;  %v878_v32 = vpop.f32.mrb[35].mxu0  ;;  %1630 = vmatmul.mubr.f32.gmra.mrb[140].mxu0 %v621_v21 }
 0x17a   : > { %1329 = vmatprep.mubr.f32.mxu1 %v626_v24  ;;  %1634 = vmatprep.mubr.f32.mxu0 %v628_v25 }
 0x17c   : > { %v3038_v39 = vpop.f32.mrb[36].mxu1  ;;  %v3040_v40 = vpop.f32.mrb[36].mxu0 }
 0x17d   : > { %v1003_v41 = vpop.f32.mrb[37].mxu1  ;;  %1330 = vmatmul.mubr.f32.gmra.mrb[142].mxu1 %v625_v33  ;;  %v883_v42 = vpop.f32.mrb[37].mxu0  ;;  %1635 = vmatmul.mubr.f32.gmra.mrb[142].mxu0 %v627_v34 }
 0x180   : > { %v3042_v43 = vpop.f32.mrb[38].mxu1  ;;  %v3044_v44 = vpop.f32.mrb[38].mxu0 }
 0x181   : > { %v1008_v51 = vpop.f32.mrb[39].mxu1  ;;  %v888_v52 = vpop.f32.mrb[39].mxu0 }
 0x182   : > { %v3064_v51 = vstv %s1993_s20 }
 0x184   : > { %v3046_v55 = vpop.f32.mrb[40].mxu1  ;;  %v3048_v56 = vpop.f32.mrb[40].mxu0 }
 0x185   : > { %v1013_v59 = vpop.f32.mrb[41].mxu1  ;;  %v893_v60 = vpop.f32.mrb[41].mxu0 }
 0x188   : > { %v3050_v1 = vpop.f32.mrb[42].mxu1  ;;  %v3052_v2 = vpop.f32.mrb[42].mxu0 }
 0x189   : > { %v1018_v8 = vpop.f32.mrb[43].mxu1  ;;  %v898_v9 = vpop.f32.mrb[43].mxu0 }
 0x18c   : > { %v3054_v10 = vpop.f32.mrb[44].mxu1  ;;  %v3056_v11 = vpop.f32.mrb[44].mxu0 }
 0x18d   : > { %v1023_v18 = vpop.f32.mrb[45].mxu1  ;;  %v903_v19 = vpop.f32.mrb[45].mxu0 }
 0x190   : > { %v3058_v20 = vpop.f32.mrb[46].mxu1  ;;  %v3060_v21 = vpop.f32.mrb[46].mxu0 }
 0x191   : > { %v1028_v24 = vpop.f32.mrb[47].mxu1  ;;  %v908_v25 = vpop.f32.mrb[47].mxu0 }
 0x194   : > { %v1096_v31 = vpop.f32.mrb[48].mxu1  ;;  %v1401_v32 = vpop.f32.mrb[48].mxu0 }
 0x195   : > { %v1097_v33 = vadd.f32 %v1096_v31, %v2898_v46  ;;  %v1098_v34 = vpop.f32.mrb[49].mxu1  ;;  %v1403_v41 = vpop.f32.mrb[49].mxu0 }
 0x197   : > { %v1402_v42 = vadd.f32 %v1401_v32, %v1097_v33 }
 0x198   : > { %v1101_v52 = vpop.f32.mrb[50].mxu1  ;;  %v1406_v59 = vpop.f32.mrb[50].mxu0 }
 0x199   : > { %v1102_v60 = vadd.f32 %v1101_v52, %v2906_v54  ;;  %v1103_v8 = vpop.f32.mrb[51].mxu1  ;;  %v1408_v9 = vpop.f32.mrb[51].mxu0  ;;  %v1789_v46 = vadd.f32 %v3064_v51, %v1402_v42 }
 0x19b   : > { %v1407_v18 = vadd.f32 %v1406_v59, %v1102_v60  ;;  %1837 = vst [vmem:[%s3070_s24] sm:$0xff] %v1789_v46 }
 0x19c   : > { %v1106_v19 = vpop.f32.mrb[52].mxu1  ;;  %v1411_v24 = vpop.f32.mrb[52].mxu0 }
 0x19d   : > { %v1107_v25 = vadd.f32 %v1106_v19, %v2914_v62  ;;  %v1108_v31 = vpop.f32.mrb[53].mxu1  ;;  %v1413_v54 = vpop.f32.mrb[53].mxu0  ;;  %v1790_v32 = vadd.f32 %v3064_v51, %v1407_v18 }
 0x19f   : > { %v1412_v33 = vadd.f32 %v1411_v24, %v1107_v25  ;;  %1838 = vst [vmem:[%s3070_s24 + $0x8] sm:$0xff] %v1790_v32 }
 0x1a0   : > { %v1111_v34 = vpop.f32.mrb[54].mxu1  ;;  %v1416_v41 = vpop.f32.mrb[54].mxu0 }
 0x1a1   : > { %v1112_v52 = vadd.f32 %v1111_v34, %v2922_v7  ;;  %v1113_v8 = vpop.f32.mrb[55].mxu1  ;;  %v1418_v42 = vpop.f32.mrb[55].mxu0  ;;  %v1791_v59 = vadd.f32 %v3064_v51, %v1412_v33 }
 0x1a3   : > { %v1417_v60 = vadd.f32 %v1416_v41, %v1112_v52  ;;  %1839 = vst [vmem:[%s3070_s24 + $0x10] sm:$0xff] %v1791_v59 }
 0x1a4   : > { %v1116_v9 = vpop.f32.mrb[56].mxu1  ;;  %v1421_v46 = vpop.f32.mrb[56].mxu0 }
 0x1a5   : > { %v1117_v62 = vadd.f32 %v1116_v9, %v2930_v15  ;;  %v1118_v19 = vpop.f32.mrb[57].mxu1  ;;  %v1423_v18 = vpop.f32.mrb[57].mxu0  ;;  %v1792_v24 = vadd.f32 %v3064_v51, %v1417_v60 }
 0x1a7   : > { %v1422_v25 = vadd.f32 %v1421_v46, %v1117_v62  ;;  %1840 = vst [vmem:[%s3070_s24 + $0x18] sm:$0xff] %v1792_v24 }
 0x1a8   : > { %v1121_v31 = vpop.f32.mrb[58].mxu1  ;;  %v1426_v54 = vpop.f32.mrb[58].mxu0 }
 0x1a9   : > { %v1122_v7 = vadd.f32 %v1121_v31, %v2938_v23  ;;  %v1123_v32 = vpop.f32.mrb[59].mxu1  ;;  %v1428_v33 = vpop.f32.mrb[59].mxu0  ;;  %v1793_v34 = vadd.f32 %v3064_v51, %v1422_v25 }
 0x1ab   : > { %v1427_v41 = vadd.f32 %v1426_v54, %v1122_v7  ;;  %1841 = vst [vmem:[%s3070_s24 + $0x20] sm:$0xff] %v1793_v34 }
 0x1ac   : > { %v1126_v52 = vpop.f32.mrb[60].mxu1  ;;  %v1431_v8 = vpop.f32.mrb[60].mxu0 }
 0x1ad   : > { %v1127_v15 = vadd.f32 %v1126_v52, %v2946_v30  ;;  %v1128_v42 = vpop.f32.mrb[61].mxu1  ;;  %v1433_v59 = vpop.f32.mrb[61].mxu0  ;;  %v1794_v60 = vadd.f32 %v3064_v51, %v1427_v41 }
 0x1af   : > { %v1432_v9 = vadd.f32 %v1431_v8, %v1127_v15  ;;  %1842 = vst [vmem:[%s3070_s24 + $0x28] sm:$0xff] %v1794_v60 }
 0x1b0   : > { %v1131_v46 = vpop.f32.mrb[62].mxu1  ;;  %v1436_v62 = vpop.f32.mrb[62].mxu0 }
 0x1b1   : > { %v1132_v23 = vadd.f32 %v1131_v46, %v2954_v38  ;;  %v1133_v19 = vpop.f32.mrb[63].mxu1  ;;  %v1438_v18 = vpop.f32.mrb[63].mxu0  ;;  %v1795_v24 = vadd.f32 %v3064_v51, %v1432_v9 }
 0x1b3   : > { %v1437_v25 = vadd.f32 %v1436_v62, %v1132_v23  ;;  %1843 = vst [vmem:[%s3070_s24 + $0x30] sm:$0xff] %v1795_v24 }
 0x1b4   : > { %v1136_v31 = vpop.f32.mrb[64].mxu1  ;;  %v1441_v54 = vpop.f32.mrb[64].mxu0 }
 0x1b5   : > { %v1137_v30 = vadd.f32 %v1136_v31, %v2962_v48  ;;  %v1138_v7 = vpop.f32.mrb[65].mxu1  ;;  %v1443_v32 = vpop.f32.mrb[65].mxu0  ;;  %v1796_v33 = vadd.f32 %v3064_v51, %v1437_v25 }
 0x1b7   : > { %v1442_v34 = vadd.f32 %v1441_v54, %v1137_v30  ;;  %1844 = vst [vmem:[%s3070_s24 + $0x38] sm:$0xff] %v1796_v33 }
 0x1b8   : > { %v1141_v41 = vpop.f32.mrb[66].mxu1  ;;  %v1446_v52 = vpop.f32.mrb[66].mxu0 }
 0x1b9   : > { %v1142_v38 = vadd.f32 %v1141_v41, %v2970_v58  ;;  %v1143_v8 = vpop.f32.mrb[67].mxu1  ;;  %v1448_v15 = vpop.f32.mrb[67].mxu0  ;;  %v1797_v42 = vadd.f32 %v3064_v51, %v1442_v34 }
 0x1bb   : > { %v1447_v59 = vadd.f32 %v1446_v52, %v1142_v38  ;;  %1845 = vst [vmem:[%s3070_s24 + $0x40] sm:$0xff] %v1797_v42 }
 0x1bc   : > { %v1146_v60 = vpop.f32.mrb[68].mxu1  ;;  %v1451_v9 = vpop.f32.mrb[68].mxu0 }
 0x1bd   : > { %v1147_v48 = vadd.f32 %v1146_v60, %v2978_v5  ;;  %v1148_v46 = vpop.f32.mrb[69].mxu1  ;;  %v1453_v62 = vpop.f32.mrb[69].mxu0  ;;  %v1798_v23 = vadd.f32 %v3064_v51, %v1447_v59 }
 0x1bf   : > { %v1452_v19 = vadd.f32 %v1451_v9, %v1147_v48  ;;  %1846 = vst [vmem:[%s3070_s24 + $0x48] sm:$0xff] %v1798_v23 }
 0x1c0   : > { %v1151_v18 = vpop.f32.mrb[70].mxu1  ;;  %v1456_v24 = vpop.f32.mrb[70].mxu0 }
 0x1c1   : > { %v1152_v58 = vadd.f32 %v1151_v18, %v2986_v17  ;;  %v1153_v25 = vpop.f32.mrb[71].mxu1  ;;  %v1458_v31 = vpop.f32.mrb[71].mxu0  ;;  %v1799_v54 = vadd.f32 %v3064_v51, %v1452_v19 }
 0x1c3   : > { %v1457_v30 = vadd.f32 %v1456_v24, %v1152_v58  ;;  %1847 = vst [vmem:[%s3070_s24 + $0x50] sm:$0xff] %v1799_v54 }
 0x1c4   : > { %v1156_v7 = vpop.f32.mrb[72].mxu1  ;;  %v1461_v32 = vpop.f32.mrb[72].mxu0 }
 0x1c5   : > { %v1157_v5 = vadd.f32 %v1156_v7, %v2994_v26  ;;  %v1158_v33 = vpop.f32.mrb[73].mxu1  ;;  %v1463_v34 = vpop.f32.mrb[73].mxu0  ;;  %v1800_v41 = vadd.f32 %v3064_v51, %v1457_v30 }
 0x1c7   : > { %v1462_v52 = vadd.f32 %v1461_v32, %v1157_v5  ;;  %1848 = vst [vmem:[%s3070_s24 + $0x58] sm:$0xff] %v1800_v41 }
 0x1c8   : > { %v1161_v38 = vpop.f32.mrb[74].mxu1  ;;  %v1466_v8 = vpop.f32.mrb[74].mxu0 }
 0x1c9   : > { %v1162_v17 = vadd.f32 %v1161_v38, %v3002_v36  ;;  %v1163_v15 = vpop.f32.mrb[75].mxu1  ;;  %v1468_v42 = vpop.f32.mrb[75].mxu0  ;;  %v1801_v59 = vadd.f32 %v3064_v51, %v1462_v52 }
 0x1cb   : > { %v1467_v60 = vadd.f32 %v1466_v8, %v1162_v17  ;;  %1849 = vst [vmem:[%s3070_s24 + $0x60] sm:$0xff] %v1801_v59 }
 0x1cc   : > { %v1166_v9 = vpop.f32.mrb[76].mxu1  ;;  %v1471_v48 = vpop.f32.mrb[76].mxu0 }
 0x1cd   : > { %v1167_v26 = vadd.f32 %v1166_v9, %v3010_v50  ;;  %v1168_v46 = vpop.f32.mrb[77].mxu1  ;;  %v1473_v62 = vpop.f32.mrb[77].mxu0  ;;  %v1802_v23 = vadd.f32 %v3064_v51, %v1467_v60 }
 0x1cf   : > { %v1472_v19 = vadd.f32 %v1471_v48, %v1167_v26  ;;  %1850 = vst [vmem:[%s3070_s24 + $0x68] sm:$0xff] %v1802_v23 }
 0x1d0   : > { %v1171_v18 = vpop.f32.mrb[78].mxu1  ;;  %v1476_v24 = vpop.f32.mrb[78].mxu0 }
 0x1d1   : > { %v1172_v36 = vadd.f32 %v1171_v18, %v3018_v0  ;;  %v1173_v58 = vpop.f32.mrb[79].mxu1  ;;  %v1478_v25 = vpop.f32.mrb[79].mxu0  ;;  %v1803_v31 = vadd.f32 %v3064_v51, %v1472_v19 }
 0x1d3   : > { %v1477_v54 = vadd.f32 %v1476_v24, %v1172_v36  ;;  %1851 = vst [vmem:[%s3070_s24 + $0x70] sm:$0xff] %v1803_v31 }
 0x1d4   : > { %v1176_v30 = vpop.f32.mrb[80].mxu1  ;;  %v1481_v7 = vpop.f32.mrb[80].mxu0 }
 0x1d5   : > { %v1177_v50 = vadd.f32 %v1176_v30, %v3026_v13  ;;  %v1178_v32 = vpop.f32.mrb[81].mxu1  ;;  %v1483_v5 = vpop.f32.mrb[81].mxu0  ;;  %v1804_v33 = vadd.f32 %v3064_v51, %v1477_v54 }
 0x1d7   : > { %v1482_v34 = vadd.f32 %v1481_v7, %v1177_v50  ;;  %1852 = vst [vmem:[%s3070_s24 + $0x78] sm:$0xff] %v1804_v33 }
 0x1d8   : > { %v1181_v41 = vpop.f32.mrb[82].mxu1  ;;  %v1486_v52 = vpop.f32.mrb[82].mxu0 }
 0x1d9   : > { %v1182_v0 = vadd.f32 %v1181_v41, %v3034_v28  ;;  %v1183_v38 = vpop.f32.mrb[83].mxu1  ;;  %v1488_v8 = vpop.f32.mrb[83].mxu0  ;;  %v1805_v17 = vadd.f32 %v3064_v51, %v1482_v34 }
 0x1db   : > { %v1487_v15 = vadd.f32 %v1486_v52, %v1182_v0  ;;  %1853 = vst [vmem:[%s3070_s24 + $0x80] sm:$0xff] %v1805_v17 }
 0x1dc   : > { %v1186_v42 = vpop.f32.mrb[84].mxu1  ;;  %v1491_v59 = vpop.f32.mrb[84].mxu0 }
 0x1dd   : > { %v1187_v13 = vadd.f32 %v1186_v42, %v3040_v40  ;;  %v1188_v60 = vpop.f32.mrb[85].mxu1  ;;  %v1493_v9 = vpop.f32.mrb[85].mxu0  ;;  %v1806_v48 = vadd.f32 %v3064_v51, %v1487_v15 }
 0x1df   : > { %v1492_v26 = vadd.f32 %v1491_v59, %v1187_v13  ;;  %1854 = vst [vmem:[%s3070_s24 + $0x88] sm:$0xff] %v1806_v48 }
 0x1e0   : > { %v1191_v46 = vpop.f32.mrb[86].mxu1  ;;  %v1496_v62 = vpop.f32.mrb[86].mxu0 }
 0x1e1   : > { %v1192_v28 = vadd.f32 %v1191_v46, %v3044_v44  ;;  %v1193_v23 = vpop.f32.mrb[87].mxu1  ;;  %v1498_v19 = vpop.f32.mrb[87].mxu0  ;;  %v1807_v18 = vadd.f32 %v3064_v51, %v1492_v26 }
 0x1e3   : > { %v1497_v24 = vadd.f32 %v1496_v62, %v1192_v28  ;;  %1855 = vst [vmem:[%s3070_s24 + $0x90] sm:$0xff] %v1807_v18 }
 0x1e4   : > { %v1196_v36 = vpop.f32.mrb[88].mxu1  ;;  %v1501_v58 = vpop.f32.mrb[88].mxu0 }
 0x1e5   : > { %v1197_v40 = vadd.f32 %v1196_v36, %v3048_v56  ;;  %v1198_v25 = vpop.f32.mrb[89].mxu1  ;;  %v1503_v31 = vpop.f32.mrb[89].mxu0  ;;  %v1808_v54 = vadd.f32 %v3064_v51, %v1497_v24 }
 0x1e7   : > { %v1502_v30 = vadd.f32 %v1501_v58, %v1197_v40  ;;  %1856 = vst [vmem:[%s3070_s24 + $0x98] sm:$0xff] %v1808_v54 }
 0x1e8   : > { %v1201_v7 = vpop.f32.mrb[90].mxu1  ;;  %v1506_v50 = vpop.f32.mrb[90].mxu0 }
 0x1e9   : > { %v1202_v44 = vadd.f32 %v1201_v7, %v3052_v2  ;;  %v1203_v32 = vpop.f32.mrb[91].mxu1  ;;  %v1508_v5 = vpop.f32.mrb[91].mxu0  ;;  %v1809_v33 = vadd.f32 %v3064_v51, %v1502_v30 }
 0x1eb   : > { %v1507_v34 = vadd.f32 %v1506_v50, %v1202_v44  ;;  %1857 = vst [vmem:[%s3070_s24 + $0xa0] sm:$0xff] %v1809_v33 }
 0x1ec   : > { %v1206_v41 = vpop.f32.mrb[92].mxu1  ;;  %v1511_v52 = vpop.f32.mrb[92].mxu0 }
 0x1ed   : > { %v1207_v56 = vadd.f32 %v1206_v41, %v3056_v11  ;;  %v1208_v0 = vpop.f32.mrb[93].mxu1  ;;  %v1513_v38 = vpop.f32.mrb[93].mxu0  ;;  %v1810_v8 = vadd.f32 %v3064_v51, %v1507_v34 }
 0x1ef   : > { %v1512_v17 = vadd.f32 %v1511_v52, %v1207_v56  ;;  %1858 = vst [vmem:[%s3070_s24 + $0xa8] sm:$0xff] %v1810_v8 }
 0x1f0   : > { %v1211_v15 = vpop.f32.mrb[94].mxu1  ;;  %v1516_v42 = vpop.f32.mrb[94].mxu0 }
 0x1f1   : > { %v1212_v2 = vadd.f32 %v1211_v15, %v3060_v21  ;;  %v1213_v59 = vpop.f32.mrb[95].mxu1  ;;  %v1518_v13 = vpop.f32.mrb[95].mxu0  ;;  %v1811_v60 = vadd.f32 %v3064_v51, %v1512_v17 }
 0x1f3   : > { %v1517_v9 = vadd.f32 %v1516_v42, %v1212_v2  ;;  %1859 = vst [vmem:[%s3070_s24 + $0xb0] sm:$0xff] %v1811_v60 }
 0x1f4   : > { %v1216_v48 = vpop.f32.mrb[96].mxu1  ;;  %v1521_v26 = vpop.f32.mrb[96].mxu0 }
 0x1f5   : > { %v1217_v11 = vadd.f32 %v1216_v48, %v2896_v45  ;;  %v1218_v46 = vpop.f32.mrb[97].mxu1  ;;  %v1523_v62 = vpop.f32.mrb[97].mxu0  ;;  %v1812_v28 = vadd.f32 %v3064_v51, %v1517_v9 }
 0x1f7   : > { %v1522_v23 = vadd.f32 %v1521_v26, %v1217_v11  ;;  %1860 = vst [vmem:[%s3070_s24 + $0xb8] sm:$0xff] %v1812_v28 }
 0x1f8   : > { %v1221_v19 = vpop.f32.mrb[98].mxu1  ;;  %v1526_v18 = vpop.f32.mrb[98].mxu0 }
 0x1f9   : > { %v1222_v21 = vadd.f32 %v1221_v19, %v2904_v53  ;;  %v1223_v24 = vpop.f32.mrb[99].mxu1  ;;  %v1528_v36 = vpop.f32.mrb[99].mxu0  ;;  %v1813_v58 = vadd.f32 %v3064_v51, %v1522_v23 }
 0x1fb   : > { %v1527_v40 = vadd.f32 %v1526_v18, %v1222_v21  ;;  %1861 = vst [vmem:[%s3070_s24 + $0xc0] sm:$0xff] %v1813_v58 }
 0x1fc   : > { %v1226_v25 = vpop.f32.mrb[100].mxu1  ;;  %v1531_v31 = vpop.f32.mrb[100].mxu0 }
 0x1fd   : > { %v1227_v45 = vadd.f32 %v1226_v25, %v2912_v61  ;;  %v1228_v54 = vpop.f32.mrb[101].mxu1  ;;  %v1533_v30 = vpop.f32.mrb[101].mxu0  ;;  %v1814_v7 = vadd.f32 %v3064_v51, %v1527_v40 }
 0x1ff   : > { %v1532_v50 = vadd.f32 %v1531_v31, %v1227_v45  ;;  %1862 = vst [vmem:[%s3070_s24 + $0xc8] sm:$0xff] %v1814_v7 }
 0x200   : > { %v1231_v44 = vpop.f32.mrb[102].mxu1  ;;  %v1536_v32 = vpop.f32.mrb[102].mxu0 }
 0x201   : > { %v1232_v53 = vadd.f32 %v1231_v44, %v2920_v6  ;;  %v1233_v5 = vpop.f32.mrb[103].mxu1  ;;  %v1538_v33 = vpop.f32.mrb[103].mxu0  ;;  %v1815_v34 = vadd.f32 %v3064_v51, %v1532_v50 }
 0x203   : > { %v1537_v41 = vadd.f32 %v1536_v32, %v1232_v53  ;;  %1863 = vst [vmem:[%s3070_s24 + $0xd0] sm:$0xff] %v1815_v34 }
 0x204   : > { %v1236_v52 = vpop.f32.mrb[104].mxu1  ;;  %v1541_v56 = vpop.f32.mrb[104].mxu0 }
 0x205   : > { %v1237_v61 = vadd.f32 %v1236_v52, %v2928_v14  ;;  %v1238_v0 = vpop.f32.mrb[105].mxu1  ;;  %v1543_v38 = vpop.f32.mrb[105].mxu0  ;;  %v1816_v8 = vadd.f32 %v3064_v51, %v1537_v41 }
 0x207   : > { %v1542_v17 = vadd.f32 %v1541_v56, %v1237_v61  ;;  %1864 = vst [vmem:[%s3070_s24 + $0xd8] sm:$0xff] %v1816_v8 }
 0x208   : > { %v1241_v15 = vpop.f32.mrb[106].mxu1  ;;  %v1546_v42 = vpop.f32.mrb[106].mxu0 }
 0x209   : > { %v1242_v6 = vadd.f32 %v1241_v15, %v2936_v22  ;;  %v1243_v2 = vpop.f32.mrb[107].mxu1  ;;  %v1548_v59 = vpop.f32.mrb[107].mxu0  ;;  %v1817_v13 = vadd.f32 %v3064_v51, %v1542_v17 }
 0x20b   : > { %v1547_v60 = vadd.f32 %v1546_v42, %v1242_v6  ;;  %1865 = vst [vmem:[%s3070_s24 + $0xe0] sm:$0xff] %v1817_v13 }
 0x20c   : > { %v1246_v9 = vpop.f32.mrb[108].mxu1  ;;  %v1551_v48 = vpop.f32.mrb[108].mxu0 }
 0x20d   : > { %v1247_v14 = vadd.f32 %v1246_v9, %v2944_v29  ;;  %v1248_v26 = vpop.f32.mrb[109].mxu1  ;;  %v1553_v11 = vpop.f32.mrb[109].mxu0  ;;  %v1818_v46 = vadd.f32 %v3064_v51, %v1547_v60 }
 0x20f   : > { %v1552_v62 = vadd.f32 %v1551_v48, %v1247_v14  ;;  %1866 = vst [vmem:[%s3070_s24 + $0xe8] sm:$0xff] %v1818_v46 }
 0x210   : > { %v1251_v28 = vpop.f32.mrb[110].mxu1  ;;  %v1556_v23 = vpop.f32.mrb[110].mxu0 }
 0x211   : > { %v1252_v22 = vadd.f32 %v1251_v28, %v2952_v37  ;;  %v1253_v19 = vpop.f32.mrb[111].mxu1  ;;  %v1558_v18 = vpop.f32.mrb[111].mxu0  ;;  %v1819_v21 = vadd.f32 %v3064_v51, %v1552_v62 }
 0x213   : > { %v1557_v24 = vadd.f32 %v1556_v23, %v1252_v22  ;;  %1867 = vst [vmem:[%s3070_s24 + $0xf0] sm:$0xff] %v1819_v21 }
 0x214   : > { %v1256_v36 = vpop.f32.mrb[112].mxu1  ;;  %v1561_v58 = vpop.f32.mrb[112].mxu0 }
 0x215   : > { %v1257_v29 = vadd.f32 %v1256_v36, %v2960_v47  ;;  %v1258_v40 = vpop.f32.mrb[113].mxu1  ;;  %v1563_v25 = vpop.f32.mrb[113].mxu0  ;;  %v1820_v31 = vadd.f32 %v3064_v51, %v1557_v24 }
 0x217   : > { %v1562_v45 = vadd.f32 %v1561_v58, %v1257_v29  ;;  %1868 = vst [vmem:[%s3070_s24 + $0xf8] sm:$0xff] %v1820_v31 }
 0x218   : > { %v1261_v54 = vpop.f32.mrb[114].mxu1  ;;  %v1566_v30 = vpop.f32.mrb[114].mxu0 }
 0x219   : > { %v1262_v37 = vadd.f32 %v1261_v54, %v2968_v57  ;;  %v1263_v7 = vpop.f32.mrb[115].mxu1  ;;  %v1568_v50 = vpop.f32.mrb[115].mxu0  ;;  %v1821_v44 = vadd.f32 %v3064_v51, %v1562_v45 }
 0x21b   : > { %v1567_v32 = vadd.f32 %v1566_v30, %v1262_v37  ;;  %1869 = vst [vmem:[%s3070_s24 + $0x100] sm:$0xff] %v1821_v44 }
 0x21c   : > { %v1266_v53 = vpop.f32.mrb[116].mxu1  ;;  %v1571_v5 = vpop.f32.mrb[116].mxu0 }
 0x21d   : > { %v1267_v47 = vadd.f32 %v1266_v53, %v2976_v4  ;;  %v1268_v33 = vpop.f32.mrb[117].mxu1  ;;  %v1573_v34 = vpop.f32.mrb[117].mxu0  ;;  %v1822_v41 = vadd.f32 %v3064_v51, %v1567_v32 }
 0x21f   : > { %v1572_v52 = vadd.f32 %v1571_v5, %v1267_v47  ;;  %1870 = vst [vmem:[%s3070_s24 + $0x108] sm:$0xff] %v1822_v41 }
 0x220   : > { %v1271_v56 = vpop.f32.mrb[118].mxu1  ;;  %v1576_v61 = vpop.f32.mrb[118].mxu0 }
 0x221   : > { %v1272_v57 = vadd.f32 %v1271_v56, %v2984_v16  ;;  %v1273_v0 = vpop.f32.mrb[119].mxu1  ;;  %v1578_v38 = vpop.f32.mrb[119].mxu0  ;;  %v1823_v8 = vadd.f32 %v3064_v51, %v1572_v52 }
 0x223   : > { %v1577_v17 = vadd.f32 %v1576_v61, %v1272_v57  ;;  %1871 = vst [vmem:[%s3070_s24 + $0x110] sm:$0xff] %v1823_v8 }
 0x224   : > { %v1276_v15 = vpop.f32.mrb[120].mxu1  ;;  %v1581_v42 = vpop.f32.mrb[120].mxu0 }
 0x225   : > { %v1277_v4 = vadd.f32 %v1276_v15, %v2992_v3  ;;  %v1278_v6 = vpop.f32.mrb[121].mxu1  ;;  %v1583_v2 = vpop.f32.mrb[121].mxu0  ;;  %v1824_v59 = vadd.f32 %v3064_v51, %v1577_v17 }
 0x227   : > { %v1582_v13 = vadd.f32 %v1581_v42, %v1277_v4  ;;  %1872 = vst [vmem:[%s3070_s24 + $0x118] sm:$0xff] %v1824_v59 }
 0x228   : > { %v1281_v60 = vpop.f32.mrb[122].mxu1  ;;  %v1586_v9 = vpop.f32.mrb[122].mxu0 }
 0x229   : > { %v1282_v16 = vadd.f32 %v1281_v60, %v3000_v35  ;;  %v1283_v48 = vpop.f32.mrb[123].mxu1  ;;  %v1588_v14 = vpop.f32.mrb[123].mxu0  ;;  %v1825_v26 = vadd.f32 %v3064_v51, %v1582_v13 }
 0x22b   : > { %v1587_v11 = vadd.f32 %v1586_v9, %v1282_v16  ;;  %1873 = vst [vmem:[%s3070_s24 + $0x120] sm:$0xff] %v1825_v26 }
 0x22c   : > { %v1286_v46 = vpop.f32.mrb[124].mxu1  ;;  %v1591_v62 = vpop.f32.mrb[124].mxu0 }
 0x22d   : > { %v1287_v3 = vadd.f32 %v1286_v46, %v3008_v49  ;;  %v1288_v28 = vpop.f32.mrb[125].mxu1  ;;  %v1593_v23 = vpop.f32.mrb[125].mxu0  ;;  %v1826_v22 = vadd.f32 %v3064_v51, %v1587_v11 }
 0x22f   : > { %v1592_v19 = vadd.f32 %v1591_v62, %v1287_v3  ;;  %1874 = vst [vmem:[%s3070_s24 + $0x128] sm:$0xff] %v1826_v22 }
 0x230   : > { %v1291_v18 = vpop.f32.mrb[126].mxu1  ;;  %v1596_v21 = vpop.f32.mrb[126].mxu0 }
 0x231   : > { %v1292_v35 = vadd.f32 %v1291_v18, %v3016_v63  ;;  %v1293_v24 = vpop.f32.mrb[127].mxu1  ;;  %v1598_v36 = vpop.f32.mrb[127].mxu0  ;;  %v1827_v58 = vadd.f32 %v3064_v51, %v1592_v19 }
 0x233   : > { %v1597_v29 = vadd.f32 %v1596_v21, %v1292_v35  ;;  %1875 = vst [vmem:[%s3070_s24 + $0x130] sm:$0xff] %v1827_v58 }
 0x234   : > { %v1296_v40 = vpop.f32.mrb[128].mxu1  ;;  %v1601_v25 = vpop.f32.mrb[128].mxu0 }
 0x235   : > { %v1297_v49 = vadd.f32 %v1296_v40, %v3024_v12  ;;  %v1298_v31 = vpop.f32.mrb[129].mxu1  ;;  %v1603_v45 = vpop.f32.mrb[129].mxu0  ;;  %v1828_v54 = vadd.f32 %v3064_v51, %v1597_v29 }
 0x237   : > { %v1602_v30 = vadd.f32 %v1601_v25, %v1297_v49  ;;  %1876 = vst [vmem:[%s3070_s24 + $0x138] sm:$0xff] %v1828_v54 }
 0x238   : > { %v1301_v37 = vpop.f32.mrb[130].mxu1  ;;  %v1606_v7 = vpop.f32.mrb[130].mxu0 }
 0x239   : > { %v1302_v63 = vadd.f32 %v1301_v37, %v3032_v27  ;;  %v1303_v50 = vpop.f32.mrb[131].mxu1  ;;  %v1608_v44 = vpop.f32.mrb[131].mxu0  ;;  %v1829_v32 = vadd.f32 %v3064_v51, %v1602_v30 }
 0x23b   : > { %v1607_v53 = vadd.f32 %v1606_v7, %v1302_v63  ;;  %1877 = vst [vmem:[%s3070_s24 + $0x140] sm:$0xff] %v1829_v32 }
 0x23c   : > { %v1306_v5 = vpop.f32.mrb[132].mxu1  ;;  %v1611_v47 = vpop.f32.mrb[132].mxu0 }
 0x23d   : > { %v1307_v12 = vadd.f32 %v1306_v5, %v3038_v39  ;;  %v1308_v33 = vpop.f32.mrb[133].mxu1  ;;  %v1613_v34 = vpop.f32.mrb[133].mxu0  ;;  %v1830_v41 = vadd.f32 %v3064_v51, %v1607_v53 }
 0x23f   : > { %v1612_v52 = vadd.f32 %v1611_v47, %v1307_v12  ;;  %1878 = vst [vmem:[%s3070_s24 + $0x148] sm:$0xff] %v1830_v41 }
 0x240   : > { %v1311_v56 = vpop.f32.mrb[134].mxu1  ;;  %v1616_v61 = vpop.f32.mrb[134].mxu0 }
 0x241   : > { %v1312_v27 = vadd.f32 %v1311_v56, %v3042_v43  ;;  %v1313_v57 = vpop.f32.mrb[135].mxu1  ;;  %v1618_v0 = vpop.f32.mrb[135].mxu0  ;;  %v1831_v38 = vadd.f32 %v3064_v51, %v1612_v52 }
 0x243   : > { %v1617_v8 = vadd.f32 %v1616_v61, %v1312_v27  ;;  %1879 = vst [vmem:[%s3070_s24 + $0x150] sm:$0xff] %v1831_v38 }
 0x244   : > { %v1316_v17 = vpop.f32.mrb[136].mxu1  ;;  %v1621_v15 = vpop.f32.mrb[136].mxu0 }
 0x245   : > { %v1317_v39 = vadd.f32 %v1316_v17, %v3046_v55  ;;  %v1318_v42 = vpop.f32.mrb[137].mxu1  ;;  %v1623_v4 = vpop.f32.mrb[137].mxu0  ;;  %v1832_v6 = vadd.f32 %v3064_v51, %v1617_v8 }
 0x247   : > { %v1622_v2 = vadd.f32 %v1621_v15, %v1317_v39  ;;  %1880 = vst [vmem:[%s3070_s24 + $0x158] sm:$0xff] %v1832_v6 }
 0x248   : > { %v1321_v59 = vpop.f32.mrb[138].mxu1  ;;  %v1626_v13 = vpop.f32.mrb[138].mxu0 }
 0x249   : > { %v1322_v43 = vadd.f32 %v1321_v59, %v3050_v1  ;;  %v1323_v60 = vpop.f32.mrb[139].mxu1  ;;  %v1628_v9 = vpop.f32.mrb[139].mxu0  ;;  %v1833_v16 = vadd.f32 %v3064_v51, %v1622_v2 }
 0x24b   : > { %v1627_v48 = vadd.f32 %v1626_v13, %v1322_v43  ;;  %1881 = vst [vmem:[%s3070_s24 + $0x160] sm:$0xff] %v1833_v16 }
 0x24c   : > { %v1326_v14 = vpop.f32.mrb[140].mxu1  ;;  %v1631_v26 = vpop.f32.mrb[140].mxu0 }
 0x24d   : > { %v1327_v55 = vadd.f32 %v1326_v14, %v3054_v10  ;;  %v1328_v11 = vpop.f32.mrb[141].mxu1  ;;  %v1633_v46 = vpop.f32.mrb[141].mxu0  ;;  %v1834_v62 = vadd.f32 %v3064_v51, %v1627_v48 }
 0x24f   : > { %v1632_v3 = vadd.f32 %v1631_v26, %v1327_v55  ;;  %1882 = vst [vmem:[%s3070_s24 + $0x168] sm:$0xff] %v1834_v62 }
 0x250   : > { %v1331_v28 = vpop.f32.mrb[142].mxu1  ;;  %v1636_v23 = vpop.f32.mrb[142].mxu0 }
 0x251   : > { %v1332_v1 = vadd.f32 %v1331_v28, %v3058_v20  ;;  %v1333_v22 = vpop.f32.mrb[143].mxu1  ;;  %v1638_v19 = vpop.f32.mrb[143].mxu0  ;;  %v1835_v18 = vadd.f32 %v3064_v51, %v1632_v3 }
 0x253   : > { %v1637_v21 = vadd.f32 %v1636_v23, %v1332_v1  ;;  %1883 = vst [vmem:[%s3070_s24 + $0x170] sm:$0xff] %v1835_v18 }
 0x255   : > { %v1836_v35 = vadd.f32 %v3064_v51, %v1637_v21 }
 0x257   : > { %1884 = vst [vmem:[%s3070_s24 + $0x178] sm:$0xff] %v1836_v35 }
 0x258 PF: > { %s14_s14 = sadd.s32 1, %s2251_s14   ;;  %s3229_s12 = smov %s2247_s13 }
 0x259   : > { %p11_p2 = scmp.ge.s32.totalorder %s14_s14, 4   ;;  %s3230_s13 = smov %s3232_s16 }
 0x25b   :  { %13 = sbr.rel (!%p11_p2) target bundleno = 2 (0x2), region = 78 }
 0x262   :  { %1907 = vsyncpa [#allocation3], 1 }
 0x263   :  { %1909 = vsyncpa [#allocation3 + $0x1], 1 }

</bundles_post_ra>
